<compile_context>
chip_gen: v5e
topology: v5e:2x2
jax: 0.10.0
libtpu: 0.0.40
codegen_flags: <defaults>
</compile_context>

<pallas_src>
import functools

import jax
import jax.numpy as jnp
from jax.experimental import pallas as pl
from jax.experimental.pallas import tpu as pltpu


def _encoder_kernel(*refs, num_layers, kernel_size, pad, batch_tile, times):
    # refs layout:
    #   [0]              x_ref  (Bt*T0, Cin0) f32, Bt samples stacked sample-major (gapless)
    #   [1 .. 5L]        per layer: w (K,Cin,Cout) bf16, b (1,Cout) f32, scale (1,Cout) f32,
    #                    shift (1,Cout) f32, P (Bt*Tout, M_full) bf16
    #   [1+5L],[2+5L]    lw (Clast, Dout) bf16, lb (1, Dout) f32
    #   [3+5L]           o_ref  (Bt*Tf, Dout) f32
    #   [4+5L ..]        per-layer padded-activation scratch (pad + Bt*(T+pad), Cin) bf16
    x_ref = refs[0]
    layer_refs = refs[1:1 + 5 * num_layers]
    lw_ref = refs[1 + 5 * num_layers]
    lb_ref = refs[2 + 5 * num_layers]
    o_ref = refs[3 + 5 * num_layers]
    pad_refs = refs[4 + 5 * num_layers:]
    bt = batch_tile

    a = x_ref[...]                                # (bt*T0, Cin0) f32, stacked & gapless
    for l in range(num_layers):
        w_ref, b_ref, sc_ref, sh_ref, p_ref = layer_refs[5 * l:5 * l + 5]
        pad_ref = pad_refs[l]
        t = times[l]
        stride = t + pad                          # per-sample row stride inside the padded scratch
        m_full = bt * t + (bt - 1) * pad          # rows of the gap-including "full" conv output

        # Zero only the halo rows, every step (cheap; robust under megacore grid sharding).
        if pad > 0:
            zeros = jnp.zeros((pad, pad_ref.shape[1]), jnp.bfloat16)
            for i in range(bt + 1):
                pad_ref[pl.ds(i * stride, pad), :] = zeros

        # Write the stacked activation into the gapped scratch; single bf16 cast per layer.
        a16 = a.astype(jnp.bfloat16)
        for i in range(bt):
            pad_ref[pl.ds(pad + i * stride, t), :] = a16[i * t:(i + 1) * t, :]

        # Conv1d(stride=1, 'same') as K shifted, contiguous MXU matmuls; f32 accumulation.
        acc = None
        for k in range(kernel_size):
            d = jnp.dot(pad_ref[pl.ds(k, m_full), :], w_ref[k],
                        preferred_element_type=jnp.float32)
            acc = d if acc is None else acc + d
        y = jnp.maximum(acc + b_ref[...], 0.0)    # conv bias + ReLU

        # AvgPool1d: one bf16 MXU matmul.  The pooling matrix also drops rows that straddle sample
        # boundaries and the ragged tail (torch truncation semantics).
        pooled = jnp.dot(p_ref[...], y.astype(jnp.bfloat16),
                         preferred_element_type=jnp.float32)      # (bt*Tout, Cout)

        # Folded inference BatchNorm applied after pooling (exactly equivalent; pool-x less VPU
        # work).  Dropout is the eval-mode identity.
        # TODO(synk): training-mode BatchNorm batch statistics and stochastic Dropout not implemented.
        a = pooled * sc_ref[...] + sh_ref[...]

    # Final Linear + Tanh (tanh runs on the EUP slot).
    z = jnp.dot(a.astype(jnp.bfloat16), lw_ref[...],
                preferred_element_type=jnp.float32) + lb_ref[...]
    o_ref[...] = jnp.tanh(z).astype(o_ref.dtype)


def _pool_matrix(bt, t, pool, pad):
    """(bt*Tout, bt*t + (bt-1)*pad) bf16 averaging matrix over the stacked, gap-including conv
    output rows; zero columns for sample-boundary garbage rows and the truncated ragged tail."""
    t_out = t // pool
    stride = t + pad
    m_full = bt * t + (bt - 1) * pad
    o = jnp.arange(bt * t_out)
    r = jnp.arange(m_full)
    tt = r % stride
    take = ((o[:, None] // t_out) == (r[None, :] // stride)) \
        & ((tt[None, :] // pool) == (o[:, None] % t_out)) \
        & (tt[None, :] < t_out * pool)
    return jnp.where(take, 1.0 / pool, 0.0).astype(jnp.bfloat16)


def downsample_encoder(x, conv_params, lw, lb, pooling_sizes, kernel_size=3, batch_tile=None):
    """x: (B, T, in_dim) f32 -> (B, T downsampled by the pools (with truncation), out_dim) f32."""
    assert kernel_size % 2 == 1, "odd kernel_size only ('same' padding, as in the module defaults)"
    B, T0, Cin0 = x.shape
    num_layers = len(conv_params)
    pad = (kernel_size - 1) // 2

    if batch_tile is None:
        batch_tile = 1
        for bt_try in range(B, 0, -1):
            if B % bt_try:
                continue
            if bt_try * T0 > 1024:              # keep conv-M / scratch modest (VMEM budget, v7x)
                continue
            if bt_try > 1 and B > 1 and B // bt_try < 2:
                continue                         # keep >=2 grid steps so both v7x TCs get work
            batch_tile = bt_try
            break
    bt = batch_tile
    assert B % bt == 0

    inputs = [x.reshape(B * T0, Cin0)]           # leading-dim collapse is free outside the kernel
    in_specs = [pl.BlockSpec((bt * T0, Cin0), lambda i: (i, 0))]
    scratch_shapes = []
    times = []
    t = T0
    for layer, pool in zip(conv_params, pooling_sizes):
        assert t // pool >= 1, "sequence became shorter than the pooling window"
        w = layer["w"]                           # (K, Cin, Cout), already bf16
        times.append(t)
        pmat = _pool_matrix(bt, t, pool, pad)
        inputs += [w, layer["b"], layer["scale"], layer["shift"], pmat]
        in_specs += [
            pl.BlockSpec(w.shape, lambda i: (0, 0, 0)),
            pl.BlockSpec(layer["b"].shape, lambda i: (0, 0)),
            pl.BlockSpec(layer["scale"].shape, lambda i: (0, 0)),
            pl.BlockSpec(layer["shift"].shape, lambda i: (0, 0)),
            pl.BlockSpec(pmat.shape, lambda i: (0, 0)),
        ]
        scratch_shapes.append(pltpu.VMEM((pad + bt * (t + pad), w.shape[1]), jnp.bfloat16))
        t = t // pool

    inputs += [lw, lb]                           # lw already bf16
    in_specs += [pl.BlockSpec(lw.shape, lambda i: (0, 0)),
                 pl.BlockSpec(lb.shape, lambda i: (0, 0))]
    out_dim = lw.shape[-1]

    kern = functools.partial(_encoder_kernel, num_layers=num_layers, kernel_size=kernel_size,
                             pad=pad, batch_tile=bt, times=tuple(times))
    out = pl.pallas_call(
        kern,
        out_shape=jax.ShapeDtypeStruct((B * t, out_dim), jnp.float32),
        grid=(B // bt,),
        in_specs=in_specs,
        out_specs=pl.BlockSpec((bt * t, out_dim), lambda i: (i, 0)),
        scratch_shapes=scratch_shapes,
        compiler_params=pltpu.CompilerParams(
            dimension_semantics=("parallel",),
            vmem_limit_bytes=32 * 1024 * 1024,
        ),
    )(*inputs)
    return out.reshape(B, t, out_dim)


def init_params(key, in_dim, conv_channels, kernel_size, out_dim):
    filters = [in_dim] + list(conv_channels)
    eps = 1e-5
    conv_params = []
    for i in range(len(conv_channels)):
        cin, cout = filters[i], filters[i + 1]
        key, kw, kb, kg, kbe, km, kv = jax.random.split(key, 7)
        bound = 1.0 / (cin * kernel_size) ** 0.5
        w = jax.random.uniform(kw, (kernel_size, cin, cout), jnp.float32, -bound, bound)
        b = jax.random.uniform(kb, (1, cout), jnp.float32, -bound, bound)
        gamma = jax.random.uniform(kg, (1, cout), jnp.float32, 0.5, 1.5)
        beta = jax.random.uniform(kbe, (1, cout), jnp.float32, -0.5, 0.5)
        rmean = jax.random.uniform(km, (1, cout), jnp.float32, -0.5, 0.5)
        rvar = jax.random.uniform(kv, (1, cout), jnp.float32, 0.5, 1.5)
        scale = gamma / jnp.sqrt(rvar + eps)
        shift = beta - rmean * scale
        # Pre-cast MXU operands to bf16 once (review: avoid per-call HBM round-trip casts).
        conv_params.append(dict(w=w.astype(jnp.bfloat16), b=b, scale=scale, shift=shift))
    clast = conv_channels[-1]
    key, kw, kb = jax.random.split(key, 3)
    bound = 1.0 / clast ** 0.5
    lw = jax.random.uniform(kw, (clast, out_dim), jnp.float32, -bound, bound).astype(jnp.bfloat16)
    lb = jax.random.uniform(kb, (1, out_dim), jnp.float32, -bound, bound)
    return conv_params, lw, lb


def reference(x, conv_params, lw, lb, pooling_sizes, kernel_size=3):
    """Pure-JAX reference with PyTorch eval semantics (conv -> relu -> bn -> pool), mirroring the
    kernel's bf16 matmul-operand casts.  A per-channel affine commutes exactly with mean pooling,
    so applying BN before pooling here matches the kernel's after-pooling order up to f32 rounding."""
    pad = (kernel_size - 1) // 2
    out = x
    for layer, pool in zip(conv_params, pooling_sizes):
        w = layer["w"]                                         # bf16 (K, Cin, Cout)
        B, T, _ = out.shape
        xp = jnp.pad(out.astype(jnp.bfloat16), ((0, 0), (pad, pad), (0, 0)))
        y = jnp.zeros((B, T, w.shape[-1]), jnp.float32)
        for k in range(kernel_size):
            y = y + jnp.einsum("btc,cd->btd", xp[:, k:k + T, :], w[k],
                               preferred_element_type=jnp.float32)
        y = jnp.maximum(y + layer["b"], 0.0)
        y = y.astype(jnp.bfloat16).astype(jnp.float32)         # mirror kernel's bf16 pooling operand
        y = y * layer["scale"] + layer["shift"]
        t_out = T // pool
        out = y[:, :t_out * pool].reshape(B, t_out, pool, -1).mean(axis=2)
    z = jnp.einsum("btc,cd->btd", out.astype(jnp.bfloat16), lw,
                   preferred_element_type=jnp.float32) + lb
    return jnp.tanh(z)


if __name__ == "__main__":
    # Small shapes consistent with the module's forward: input (B, T, in_dim).
    in_dim, out_dim = 16, 16
    conv_channels = [16, 32, 32, 32]
    pooling_sizes = (2, 2, 2, 2)
    kernel_size = 3
    B, T = 8, 32      # -> batch tile 4 with a 2-step "parallel" grid (both v7x TensorCores busy)

    key = jax.random.PRNGKey(0)
    kx, kp = jax.random.split(key)
    x = jax.random.normal(kx, (B, T, in_dim), jnp.float32)
    conv_params, lw, lb = init_params(kp, in_dim, conv_channels, kernel_size, out_dim)

    encoder = jax.jit(downsample_encoder,
                      static_argnames=("pooling_sizes", "kernel_size", "batch_tile"))
    y = encoder(x, conv_params, lw, lb,
                pooling_sizes=pooling_sizes, kernel_size=kernel_size)
    y = jax.block_until_ready(y)

    y_ref = reference(x, conv_params, lw, lb, pooling_sizes, kernel_size)
    assert y.shape == (B, T // 16, out_dim), y.shape
    assert jnp.allclose(y, y_ref, atol=2e-3, rtol=2e-3), float(jnp.max(jnp.abs(y - y_ref)))
    print("KERNEL_OK")
</pallas_src>

<mosaic_0001>
module attributes {stable_mosaic.version = 11 : i64} {
  func.func @_encoder_kernel(%arg0: i32, %arg1: memref<128x16xf32, #tpu.memory_space<vmem>>, %arg2: memref<3x16x16xbf16, #tpu.memory_space<vmem>>, %arg3: memref<1x16xf32, #tpu.memory_space<vmem>>, %arg4: memref<1x16xf32, #tpu.memory_space<vmem>>, %arg5: memref<1x16xf32, #tpu.memory_space<vmem>>, %arg6: memref<64x131xbf16, #tpu.memory_space<vmem>>, %arg7: memref<3x16x32xbf16, #tpu.memory_space<vmem>>, %arg8: memref<1x32xf32, #tpu.memory_space<vmem>>, %arg9: memref<1x32xf32, #tpu.memory_space<vmem>>, %arg10: memref<1x32xf32, #tpu.memory_space<vmem>>, %arg11: memref<32x67xbf16, #tpu.memory_space<vmem>>, %arg12: memref<3x32x32xbf16, #tpu.memory_space<vmem>>, %arg13: memref<1x32xf32, #tpu.memory_space<vmem>>, %arg14: memref<1x32xf32, #tpu.memory_space<vmem>>, %arg15: memref<1x32xf32, #tpu.memory_space<vmem>>, %arg16: memref<16x35xbf16, #tpu.memory_space<vmem>>, %arg17: memref<3x32x32xbf16, #tpu.memory_space<vmem>>, %arg18: memref<1x32xf32, #tpu.memory_space<vmem>>, %arg19: memref<1x32xf32, #tpu.memory_space<vmem>>, %arg20: memref<1x32xf32, #tpu.memory_space<vmem>>, %arg21: memref<8x19xbf16, #tpu.memory_space<vmem>>, %arg22: memref<32x16xbf16, #tpu.memory_space<vmem>>, %arg23: memref<1x16xf32, #tpu.memory_space<vmem>>, %arg24: memref<8x16xf32, #tpu.memory_space<vmem>>, %arg25: memref<133x16xbf16, #tpu.memory_space<vmem>>, %arg26: memref<69x16xbf16, #tpu.memory_space<vmem>>, %arg27: memref<37x32xbf16, #tpu.memory_space<vmem>>, %arg28: memref<21x32xbf16, #tpu.memory_space<vmem>>) attributes {dimension_semantics = [#tpu.dimension_semantics<parallel>], iteration_bounds = array<i64: 2>, scalar_prefetch = 0 : i64, scratch_operands = 4 : i64, tpu.core_type = #tpu.core_type<tc>, window_params = [{transform_indices = @transform_0, window_bounds = array<i64: 128, 16>}, {pipeline_mode = #tpu.pipeline_mode<synchronous>, transform_indices = @transform_1, window_bounds = array<i64: 3, 16, 16>}, {pipeline_mode = #tpu.pipeline_mode<synchronous>, transform_indices = @transform_2, window_bounds = array<i64: 1, 16>}, {pipeline_mode = #tpu.pipeline_mode<synchronous>, transform_indices = @transform_3, window_bounds = array<i64: 1, 16>}, {pipeline_mode = #tpu.pipeline_mode<synchronous>, transform_indices = @transform_4, window_bounds = array<i64: 1, 16>}, {pipeline_mode = #tpu.pipeline_mode<synchronous>, transform_indices = @transform_5, window_bounds = array<i64: 64, 131>}, {pipeline_mode = #tpu.pipeline_mode<synchronous>, transform_indices = @transform_6, window_bounds = array<i64: 3, 16, 32>}, {pipeline_mode = #tpu.pipeline_mode<synchronous>, transform_indices = @transform_7, window_bounds = array<i64: 1, 32>}, {pipeline_mode = #tpu.pipeline_mode<synchronous>, transform_indices = @transform_8, window_bounds = array<i64: 1, 32>}, {pipeline_mode = #tpu.pipeline_mode<synchronous>, transform_indices = @transform_9, window_bounds = array<i64: 1, 32>}, {pipeline_mode = #tpu.pipeline_mode<synchronous>, transform_indices = @transform_10, window_bounds = array<i64: 32, 67>}, {pipeline_mode = #tpu.pipeline_mode<synchronous>, transform_indices = @transform_11, window_bounds = array<i64: 3, 32, 32>}, {pipeline_mode = #tpu.pipeline_mode<synchronous>, transform_indices = @transform_12, window_bounds = array<i64: 1, 32>}, {pipeline_mode = #tpu.pipeline_mode<synchronous>, transform_indices = @transform_13, window_bounds = array<i64: 1, 32>}, {pipeline_mode = #tpu.pipeline_mode<synchronous>, transform_indices = @transform_14, window_bounds = array<i64: 1, 32>}, {pipeline_mode = #tpu.pipeline_mode<synchronous>, transform_indices = @transform_15, window_bounds = array<i64: 16, 35>}, {pipeline_mode = #tpu.pipeline_mode<synchronous>, transform_indices = @transform_16, window_bounds = array<i64: 3, 32, 32>}, {pipeline_mode = #tpu.pipeline_mode<synchronous>, transform_indices = @transform_17, window_bounds = array<i64: 1, 32>}, {pipeline_mode = #tpu.pipeline_mode<synchronous>, transform_indices = @transform_18, window_bounds = array<i64: 1, 32>}, {pipeline_mode = #tpu.pipeline_mode<synchronous>, transform_indices = @transform_19, window_bounds = array<i64: 1, 32>}, {pipeline_mode = #tpu.pipeline_mode<synchronous>, transform_indices = @transform_20, window_bounds = array<i64: 8, 19>}, {pipeline_mode = #tpu.pipeline_mode<synchronous>, transform_indices = @transform_21, window_bounds = array<i64: 32, 16>}, {pipeline_mode = #tpu.pipeline_mode<synchronous>, transform_indices = @transform_22, window_bounds = array<i64: 1, 16>}, {transform_indices = @transform_23, window_bounds = array<i64: 8, 16>}]} {
    %c0 = arith.constant 0 : index
    %c0_0 = arith.constant 0 : index
    %0 = vector.load %arg1[%c0, %c0_0] : memref<128x16xf32, #tpu.memory_space<vmem>>, vector<128x16xf32>
    %cst = arith.constant 0.000000e+00 : bf16
    %1 = vector.broadcast %cst : bf16 to vector<1x16xbf16>
    %c0_1 = arith.constant 0 : index
    %c0_2 = arith.constant 0 : index
    %2 = vector.load %arg25[%c0_1, %c0_2] : memref<133x16xbf16, #tpu.memory_space<vmem>>, vector<1x16xbf16>
    tpu.vector_store %arg25[%c0_1, %c0_2], %1 {strides = array<i32>} : memref<133x16xbf16, #tpu.memory_space<vmem>>, vector<1x16xbf16>,
    %c33 = arith.constant 33 : index
    %c0_3 = arith.constant 0 : index
    %3 = vector.load %arg25[%c33, %c0_3] : memref<133x16xbf16, #tpu.memory_space<vmem>>, vector<1x16xbf16>
    tpu.vector_store %arg25[%c33, %c0_3], %1 {strides = array<i32>} : memref<133x16xbf16, #tpu.memory_space<vmem>>, vector<1x16xbf16>,
    %c66 = arith.constant 66 : index
    %c0_4 = arith.constant 0 : index
    %4 = vector.load %arg25[%c66, %c0_4] : memref<133x16xbf16, #tpu.memory_space<vmem>>, vector<1x16xbf16>
    tpu.vector_store %arg25[%c66, %c0_4], %1 {strides = array<i32>} : memref<133x16xbf16, #tpu.memory_space<vmem>>, vector<1x16xbf16>,
    %c99 = arith.constant 99 : index
    %c0_5 = arith.constant 0 : index
    %5 = vector.load %arg25[%c99, %c0_5] : memref<133x16xbf16, #tpu.memory_space<vmem>>, vector<1x16xbf16>
    tpu.vector_store %arg25[%c99, %c0_5], %1 {strides = array<i32>} : memref<133x16xbf16, #tpu.memory_space<vmem>>, vector<1x16xbf16>,
    %c132 = arith.constant 132 : index
    %c0_6 = arith.constant 0 : index
    %6 = vector.load %arg25[%c132, %c0_6] : memref<133x16xbf16, #tpu.memory_space<vmem>>, vector<1x16xbf16>
    tpu.vector_store %arg25[%c132, %c0_6], %1 {strides = array<i32>} : memref<133x16xbf16, #tpu.memory_space<vmem>>, vector<1x16xbf16>,
    %7 = arith.truncf %0 : vector<128x16xf32> to vector<128x16xbf16>
    %8 = vector.extract_strided_slice %7 {offsets = [0, 0], sizes = [32, 16], strides = [1, 1]} : vector<128x16xbf16> to vector<32x16xbf16>
    %c1 = arith.constant 1 : index
    %c0_7 = arith.constant 0 : index
    %9 = vector.load %arg25[%c1, %c0_7] : memref<133x16xbf16, #tpu.memory_space<vmem>>, vector<32x16xbf16>
    tpu.vector_store %arg25[%c1, %c0_7], %8 {strides = array<i32>} : memref<133x16xbf16, #tpu.memory_space<vmem>>, vector<32x16xbf16>,
    %10 = vector.extract_strided_slice %7 {offsets = [32, 0], sizes = [32, 16], strides = [1, 1]} : vector<128x16xbf16> to vector<32x16xbf16>
    %c34 = arith.constant 34 : index
    %c0_8 = arith.constant 0 : index
    %11 = vector.load %arg25[%c34, %c0_8] : memref<133x16xbf16, #tpu.memory_space<vmem>>, vector<32x16xbf16>
    tpu.vector_store %arg25[%c34, %c0_8], %10 {strides = array<i32>} : memref<133x16xbf16, #tpu.memory_space<vmem>>, vector<32x16xbf16>,
    %12 = vector.extract_strided_slice %7 {offsets = [64, 0], sizes = [32, 16], strides = [1, 1]} : vector<128x16xbf16> to vector<32x16xbf16>
    %c67 = arith.constant 67 : index
    %c0_9 = arith.constant 0 : index
    %13 = vector.load %arg25[%c67, %c0_9] : memref<133x16xbf16, #tpu.memory_space<vmem>>, vector<32x16xbf16>
    tpu.vector_store %arg25[%c67, %c0_9], %12 {strides = array<i32>} : memref<133x16xbf16, #tpu.memory_space<vmem>>, vector<32x16xbf16>,
    %14 = vector.extract_strided_slice %7 {offsets = [96, 0], sizes = [32, 16], strides = [1, 1]} : vector<128x16xbf16> to vector<32x16xbf16>
    %c100 = arith.constant 100 : index
    %c0_10 = arith.constant 0 : index
    %15 = vector.load %arg25[%c100, %c0_10] : memref<133x16xbf16, #tpu.memory_space<vmem>>, vector<32x16xbf16>
    tpu.vector_store %arg25[%c100, %c0_10], %14 {strides = array<i32>} : memref<133x16xbf16, #tpu.memory_space<vmem>>, vector<32x16xbf16>,
    %c0_11 = arith.constant 0 : index
    %c0_12 = arith.constant 0 : index
    %16 = vector.load %arg25[%c0_11, %c0_12] : memref<133x16xbf16, #tpu.memory_space<vmem>>, vector<131x16xbf16>
    %c0_13 = arith.constant 0 : index
    %c0_14 = arith.constant 0 : index
    %c0_15 = arith.constant 0 : index
    %17 = vector.load %arg2[%c0_13, %c0_14, %c0_15] : memref<3x16x16xbf16, #tpu.memory_space<vmem>>, vector<1x16x16xbf16>
    %18 = vector.shape_cast %17 : vector<1x16x16xbf16> to vector<16x16xbf16>
    %cst_16 = arith.constant dense<0.000000e+00> : vector<131x16xf32>
    %19 = tpu.matmul %16, %18, %cst_16 {dimension_numbers = #tpu.dot_dimension_numbers<[1], [0], [0], [1], [0, 0, 1, 1], [], []>} : vector<131x16xbf16>, vector<16x16xbf16>, vector<131x16xf32> -> vector<131x16xf32>
    %c1_17 = arith.constant 1 : index
    %c0_18 = arith.constant 0 : index
    %20 = vector.load %arg25[%c1_17, %c0_18] : memref<133x16xbf16, #tpu.memory_space<vmem>>, vector<131x16xbf16>
    %c1_19 = arith.constant 1 : index
    %c0_20 = arith.constant 0 : index
    %c0_21 = arith.constant 0 : index
    %21 = vector.load %arg2[%c1_19, %c0_20, %c0_21] : memref<3x16x16xbf16, #tpu.memory_space<vmem>>, vector<1x16x16xbf16>
    %22 = vector.shape_cast %21 : vector<1x16x16xbf16> to vector<16x16xbf16>
    %cst_22 = arith.constant dense<0.000000e+00> : vector<131x16xf32>
    %23 = tpu.matmul %20, %22, %cst_22 {dimension_numbers = #tpu.dot_dimension_numbers<[1], [0], [0], [1], [0, 0, 1, 1], [], []>} : vector<131x16xbf16>, vector<16x16xbf16>, vector<131x16xf32> -> vector<131x16xf32>
    %24 = arith.addf %19, %23 : vector<131x16xf32>
    %c2 = arith.constant 2 : index
    %c0_23 = arith.constant 0 : index
    %25 = vector.load %arg25[%c2, %c0_23] : memref<133x16xbf16, #tpu.memory_space<vmem>>, vector<131x16xbf16>
    %c2_24 = arith.constant 2 : index
    %c0_25 = arith.constant 0 : index
    %c0_26 = arith.constant 0 : index
    %26 = vector.load %arg2[%c2_24, %c0_25, %c0_26] : memref<3x16x16xbf16, #tpu.memory_space<vmem>>, vector<1x16x16xbf16>
    %27 = vector.shape_cast %26 : vector<1x16x16xbf16> to vector<16x16xbf16>
    %cst_27 = arith.constant dense<0.000000e+00> : vector<131x16xf32>
    %28 = tpu.matmul %25, %27, %cst_27 {dimension_numbers = #tpu.dot_dimension_numbers<[1], [0], [0], [1], [0, 0, 1, 1], [], []>} : vector<131x16xbf16>, vector<16x16xbf16>, vector<131x16xf32> -> vector<131x16xf32>
    %29 = arith.addf %24, %28 : vector<131x16xf32>
    %c0_28 = arith.constant 0 : index
    %c0_29 = arith.constant 0 : index
    %30 = vector.load %arg3[%c0_28, %c0_29] : memref<1x16xf32, #tpu.memory_space<vmem>>, vector<1x16xf32>
    %31 = vector.broadcast %30 : vector<1x16xf32> to vector<131x16xf32>
    %32 = arith.addf %29, %31 : vector<131x16xf32>
    %cst_30 = arith.constant 0.000000e+00 : f32
    %33 = vector.broadcast %cst_30 : f32 to vector<131x16xf32>
    %34 = arith.maximumf %32, %33 : vector<131x16xf32>
    %c0_31 = arith.constant 0 : index
    %c0_32 = arith.constant 0 : index
    %35 = vector.load %arg6[%c0_31, %c0_32] : memref<64x131xbf16, #tpu.memory_space<vmem>>, vector<64x131xbf16>
    %36 = arith.truncf %34 : vector<131x16xf32> to vector<131x16xbf16>
    %cst_33 = arith.constant dense<0.000000e+00> : vector<64x16xf32>
    %37 = tpu.matmul %35, %36, %cst_33 {dimension_numbers = #tpu.dot_dimension_numbers<[1], [0], [0], [1], [0, 0, 1, 1], [], []>} : vector<64x131xbf16>, vector<131x16xbf16>, vector<64x16xf32> -> vector<64x16xf32>
    %c0_34 = arith.constant 0 : index
    %c0_35 = arith.constant 0 : index
    %38 = vector.load %arg4[%c0_34, %c0_35] : memref<1x16xf32, #tpu.memory_space<vmem>>, vector<1x16xf32>
    %39 = vector.broadcast %38 : vector<1x16xf32> to vector<64x16xf32>
    %40 = arith.mulf %37, %39 : vector<64x16xf32>
    %c0_36 = arith.constant 0 : index
    %c0_37 = arith.constant 0 : index
    %41 = vector.load %arg5[%c0_36, %c0_37] : memref<1x16xf32, #tpu.memory_space<vmem>>, vector<1x16xf32>
    %42 = vector.broadcast %41 : vector<1x16xf32> to vector<64x16xf32>
    %43 = arith.addf %40, %42 : vector<64x16xf32>
    %cst_38 = arith.constant 0.000000e+00 : bf16
    %44 = vector.broadcast %cst_38 : bf16 to vector<1x16xbf16>
    %c0_39 = arith.constant 0 : index
    %c0_40 = arith.constant 0 : index
    %45 = vector.load %arg26[%c0_39, %c0_40] : memref<69x16xbf16, #tpu.memory_space<vmem>>, vector<1x16xbf16>
    tpu.vector_store %arg26[%c0_39, %c0_40], %44 {strides = array<i32>} : memref<69x16xbf16, #tpu.memory_space<vmem>>, vector<1x16xbf16>,
    %c17 = arith.constant 17 : index
    %c0_41 = arith.constant 0 : index
    %46 = vector.load %arg26[%c17, %c0_41] : memref<69x16xbf16, #tpu.memory_space<vmem>>, vector<1x16xbf16>
    tpu.vector_store %arg26[%c17, %c0_41], %44 {strides = array<i32>} : memref<69x16xbf16, #tpu.memory_space<vmem>>, vector<1x16xbf16>,
    %c34_42 = arith.constant 34 : index
    %c0_43 = arith.constant 0 : index
    %47 = vector.load %arg26[%c34_42, %c0_43] : memref<69x16xbf16, #tpu.memory_space<vmem>>, vector<1x16xbf16>
    tpu.vector_store %arg26[%c34_42, %c0_43], %44 {strides = array<i32>} : memref<69x16xbf16, #tpu.memory_space<vmem>>, vector<1x16xbf16>,
    %c51 = arith.constant 51 : index
    %c0_44 = arith.constant 0 : index
    %48 = vector.load %arg26[%c51, %c0_44] : memref<69x16xbf16, #tpu.memory_space<vmem>>, vector<1x16xbf16>
    tpu.vector_store %arg26[%c51, %c0_44], %44 {strides = array<i32>} : memref<69x16xbf16, #tpu.memory_space<vmem>>, vector<1x16xbf16>,
    %c68 = arith.constant 68 : index
    %c0_45 = arith.constant 0 : index
    %49 = vector.load %arg26[%c68, %c0_45] : memref<69x16xbf16, #tpu.memory_space<vmem>>, vector<1x16xbf16>
    tpu.vector_store %arg26[%c68, %c0_45], %44 {strides = array<i32>} : memref<69x16xbf16, #tpu.memory_space<vmem>>, vector<1x16xbf16>,
    %50 = arith.truncf %43 : vector<64x16xf32> to vector<64x16xbf16>
    %51 = vector.extract_strided_slice %50 {offsets = [0, 0], sizes = [16, 16], strides = [1, 1]} : vector<64x16xbf16> to vector<16x16xbf16>
    %c1_46 = arith.constant 1 : index
    %c0_47 = arith.constant 0 : index
    %52 = vector.load %arg26[%c1_46, %c0_47] : memref<69x16xbf16, #tpu.memory_space<vmem>>, vector<16x16xbf16>
    tpu.vector_store %arg26[%c1_46, %c0_47], %51 {strides = array<i32>} : memref<69x16xbf16, #tpu.memory_space<vmem>>, vector<16x16xbf16>,
    %53 = vector.extract_strided_slice %50 {offsets = [16, 0], sizes = [16, 16], strides = [1, 1]} : vector<64x16xbf16> to vector<16x16xbf16>
    %c18 = arith.constant 18 : index
    %c0_48 = arith.constant 0 : index
    %54 = vector.load %arg26[%c18, %c0_48] : memref<69x16xbf16, #tpu.memory_space<vmem>>, vector<16x16xbf16>
    tpu.vector_store %arg26[%c18, %c0_48], %53 {strides = array<i32>} : memref<69x16xbf16, #tpu.memory_space<vmem>>, vector<16x16xbf16>,
    %55 = vector.extract_strided_slice %50 {offsets = [32, 0], sizes = [16, 16], strides = [1, 1]} : vector<64x16xbf16> to vector<16x16xbf16>
    %c35 = arith.constant 35 : index
    %c0_49 = arith.constant 0 : index
    %56 = vector.load %arg26[%c35, %c0_49] : memref<69x16xbf16, #tpu.memory_space<vmem>>, vector<16x16xbf16>
    tpu.vector_store %arg26[%c35, %c0_49], %55 {strides = array<i32>} : memref<69x16xbf16, #tpu.memory_space<vmem>>, vector<16x16xbf16>,
    %57 = vector.extract_strided_slice %50 {offsets = [48, 0], sizes = [16, 16], strides = [1, 1]} : vector<64x16xbf16> to vector<16x16xbf16>
    %c52 = arith.constant 52 : index
    %c0_50 = arith.constant 0 : index
    %58 = vector.load %arg26[%c52, %c0_50] : memref<69x16xbf16, #tpu.memory_space<vmem>>, vector<16x16xbf16>
    tpu.vector_store %arg26[%c52, %c0_50], %57 {strides = array<i32>} : memref<69x16xbf16, #tpu.memory_space<vmem>>, vector<16x16xbf16>,
    %c0_51 = arith.constant 0 : index
    %c0_52 = arith.constant 0 : index
    %59 = vector.load %arg26[%c0_51, %c0_52] : memref<69x16xbf16, #tpu.memory_space<vmem>>, vector<67x16xbf16>
    %c0_53 = arith.constant 0 : index
    %c0_54 = arith.constant 0 : index
    %c0_55 = arith.constant 0 : index
    %60 = vector.load %arg7[%c0_53, %c0_54, %c0_55] : memref<3x16x32xbf16, #tpu.memory_space<vmem>>, vector<1x16x32xbf16>
    %61 = vector.shape_cast %60 : vector<1x16x32xbf16> to vector<16x32xbf16>
    %cst_56 = arith.constant dense<0.000000e+00> : vector<67x32xf32>
    %62 = tpu.matmul %59, %61, %cst_56 {dimension_numbers = #tpu.dot_dimension_numbers<[1], [0], [0], [1], [0, 0, 1, 1], [], []>} : vector<67x16xbf16>, vector<16x32xbf16>, vector<67x32xf32> -> vector<67x32xf32>
    %c1_57 = arith.constant 1 : index
    %c0_58 = arith.constant 0 : index
    %63 = vector.load %arg26[%c1_57, %c0_58] : memref<69x16xbf16, #tpu.memory_space<vmem>>, vector<67x16xbf16>
    %c1_59 = arith.constant 1 : index
    %c0_60 = arith.constant 0 : index
    %c0_61 = arith.constant 0 : index
    %64 = vector.load %arg7[%c1_59, %c0_60, %c0_61] : memref<3x16x32xbf16, #tpu.memory_space<vmem>>, vector<1x16x32xbf16>
    %65 = vector.shape_cast %64 : vector<1x16x32xbf16> to vector<16x32xbf16>
    %cst_62 = arith.constant dense<0.000000e+00> : vector<67x32xf32>
    %66 = tpu.matmul %63, %65, %cst_62 {dimension_numbers = #tpu.dot_dimension_numbers<[1], [0], [0], [1], [0, 0, 1, 1], [], []>} : vector<67x16xbf16>, vector<16x32xbf16>, vector<67x32xf32> -> vector<67x32xf32>
    %67 = arith.addf %62, %66 : vector<67x32xf32>
    %c2_63 = arith.constant 2 : index
    %c0_64 = arith.constant 0 : index
    %68 = vector.load %arg26[%c2_63, %c0_64] : memref<69x16xbf16, #tpu.memory_space<vmem>>, vector<67x16xbf16>
    %c2_65 = arith.constant 2 : index
    %c0_66 = arith.constant 0 : index
    %c0_67 = arith.constant 0 : index
    %69 = vector.load %arg7[%c2_65, %c0_66, %c0_67] : memref<3x16x32xbf16, #tpu.memory_space<vmem>>, vector<1x16x32xbf16>
    %70 = vector.shape_cast %69 : vector<1x16x32xbf16> to vector<16x32xbf16>
    %cst_68 = arith.constant dense<0.000000e+00> : vector<67x32xf32>
    %71 = tpu.matmul %68, %70, %cst_68 {dimension_numbers = #tpu.dot_dimension_numbers<[1], [0], [0], [1], [0, 0, 1, 1], [], []>} : vector<67x16xbf16>, vector<16x32xbf16>, vector<67x32xf32> -> vector<67x32xf32>
    %72 = arith.addf %67, %71 : vector<67x32xf32>
    %c0_69 = arith.constant 0 : index
    %c0_70 = arith.constant 0 : index
    %73 = vector.load %arg8[%c0_69, %c0_70] : memref<1x32xf32, #tpu.memory_space<vmem>>, vector<1x32xf32>
    %74 = vector.broadcast %73 : vector<1x32xf32> to vector<67x32xf32>
    %75 = arith.addf %72, %74 : vector<67x32xf32>
    %cst_71 = arith.constant 0.000000e+00 : f32
    %76 = vector.broadcast %cst_71 : f32 to vector<67x32xf32>
    %77 = arith.maximumf %75, %76 : vector<67x32xf32>
    %c0_72 = arith.constant 0 : index
    %c0_73 = arith.constant 0 : index
    %78 = vector.load %arg11[%c0_72, %c0_73] : memref<32x67xbf16, #tpu.memory_space<vmem>>, vector<32x67xbf16>
    %79 = arith.truncf %77 : vector<67x32xf32> to vector<67x32xbf16>
    %cst_74 = arith.constant dense<0.000000e+00> : vector<32x32xf32>
    %80 = tpu.matmul %78, %79, %cst_74 {dimension_numbers = #tpu.dot_dimension_numbers<[1], [0], [0], [1], [0, 0, 1, 1], [], []>} : vector<32x67xbf16>, vector<67x32xbf16>, vector<32x32xf32> -> vector<32x32xf32>
    %c0_75 = arith.constant 0 : index
    %c0_76 = arith.constant 0 : index
    %81 = vector.load %arg9[%c0_75, %c0_76] : memref<1x32xf32, #tpu.memory_space<vmem>>, vector<1x32xf32>
    %82 = vector.broadcast %81 : vector<1x32xf32> to vector<32x32xf32>
    %83 = arith.mulf %80, %82 : vector<32x32xf32>
    %c0_77 = arith.constant 0 : index
    %c0_78 = arith.constant 0 : index
    %84 = vector.load %arg10[%c0_77, %c0_78] : memref<1x32xf32, #tpu.memory_space<vmem>>, vector<1x32xf32>
    %85 = vector.broadcast %84 : vector<1x32xf32> to vector<32x32xf32>
    %86 = arith.addf %83, %85 : vector<32x32xf32>
    %cst_79 = arith.constant 0.000000e+00 : bf16
    %87 = vector.broadcast %cst_79 : bf16 to vector<1x32xbf16>
    %c0_80 = arith.constant 0 : index
    %c0_81 = arith.constant 0 : index
    %88 = vector.load %arg27[%c0_80, %c0_81] : memref<37x32xbf16, #tpu.memory_space<vmem>>, vector<1x32xbf16>
    tpu.vector_store %arg27[%c0_80, %c0_81], %87 {strides = array<i32>} : memref<37x32xbf16, #tpu.memory_space<vmem>>, vector<1x32xbf16>,
    %c9 = arith.constant 9 : index
    %c0_82 = arith.constant 0 : index
    %89 = vector.load %arg27[%c9, %c0_82] : memref<37x32xbf16, #tpu.memory_space<vmem>>, vector<1x32xbf16>
    tpu.vector_store %arg27[%c9, %c0_82], %87 {strides = array<i32>} : memref<37x32xbf16, #tpu.memory_space<vmem>>, vector<1x32xbf16>,
    %c18_83 = arith.constant 18 : index
    %c0_84 = arith.constant 0 : index
    %90 = vector.load %arg27[%c18_83, %c0_84] : memref<37x32xbf16, #tpu.memory_space<vmem>>, vector<1x32xbf16>
    tpu.vector_store %arg27[%c18_83, %c0_84], %87 {strides = array<i32>} : memref<37x32xbf16, #tpu.memory_space<vmem>>, vector<1x32xbf16>,
    %c27 = arith.constant 27 : index
    %c0_85 = arith.constant 0 : index
    %91 = vector.load %arg27[%c27, %c0_85] : memref<37x32xbf16, #tpu.memory_space<vmem>>, vector<1x32xbf16>
    tpu.vector_store %arg27[%c27, %c0_85], %87 {strides = array<i32>} : memref<37x32xbf16, #tpu.memory_space<vmem>>, vector<1x32xbf16>,
    %c36 = arith.constant 36 : index
    %c0_86 = arith.constant 0 : index
    %92 = vector.load %arg27[%c36, %c0_86] : memref<37x32xbf16, #tpu.memory_space<vmem>>, vector<1x32xbf16>
    tpu.vector_store %arg27[%c36, %c0_86], %87 {strides = array<i32>} : memref<37x32xbf16, #tpu.memory_space<vmem>>, vector<1x32xbf16>,
    %93 = arith.truncf %86 : vector<32x32xf32> to vector<32x32xbf16>
    %94 = vector.extract_strided_slice %93 {offsets = [0, 0], sizes = [8, 32], strides = [1, 1]} : vector<32x32xbf16> to vector<8x32xbf16>
    %c1_87 = arith.constant 1 : index
    %c0_88 = arith.constant 0 : index
    %95 = vector.load %arg27[%c1_87, %c0_88] : memref<37x32xbf16, #tpu.memory_space<vmem>>, vector<8x32xbf16>
    tpu.vector_store %arg27[%c1_87, %c0_88], %94 {strides = array<i32>} : memref<37x32xbf16, #tpu.memory_space<vmem>>, vector<8x32xbf16>,
    %96 = vector.extract_strided_slice %93 {offsets = [8, 0], sizes = [8, 32], strides = [1, 1]} : vector<32x32xbf16> to vector<8x32xbf16>
    %c10 = arith.constant 10 : index
    %c0_89 = arith.constant 0 : index
    %97 = vector.load %arg27[%c10, %c0_89] : memref<37x32xbf16, #tpu.memory_space<vmem>>, vector<8x32xbf16>
    tpu.vector_store %arg27[%c10, %c0_89], %96 {strides = array<i32>} : memref<37x32xbf16, #tpu.memory_space<vmem>>, vector<8x32xbf16>,
    %98 = vector.extract_strided_slice %93 {offsets = [16, 0], sizes = [8, 32], strides = [1, 1]} : vector<32x32xbf16> to vector<8x32xbf16>
    %c19 = arith.constant 19 : index
    %c0_90 = arith.constant 0 : index
    %99 = vector.load %arg27[%c19, %c0_90] : memref<37x32xbf16, #tpu.memory_space<vmem>>, vector<8x32xbf16>
    tpu.vector_store %arg27[%c19, %c0_90], %98 {strides = array<i32>} : memref<37x32xbf16, #tpu.memory_space<vmem>>, vector<8x32xbf16>,
    %100 = vector.extract_strided_slice %93 {offsets = [24, 0], sizes = [8, 32], strides = [1, 1]} : vector<32x32xbf16> to vector<8x32xbf16>
    %c28 = arith.constant 28 : index
    %c0_91 = arith.constant 0 : index
    %101 = vector.load %arg27[%c28, %c0_91] : memref<37x32xbf16, #tpu.memory_space<vmem>>, vector<8x32xbf16>
    tpu.vector_store %arg27[%c28, %c0_91], %100 {strides = array<i32>} : memref<37x32xbf16, #tpu.memory_space<vmem>>, vector<8x32xbf16>,
    %c0_92 = arith.constant 0 : index
    %c0_93 = arith.constant 0 : index
    %102 = vector.load %arg27[%c0_92, %c0_93] : memref<37x32xbf16, #tpu.memory_space<vmem>>, vector<35x32xbf16>
    %c0_94 = arith.constant 0 : index
    %c0_95 = arith.constant 0 : index
    %c0_96 = arith.constant 0 : index
    %103 = vector.load %arg12[%c0_94, %c0_95, %c0_96] : memref<3x32x32xbf16, #tpu.memory_space<vmem>>, vector<1x32x32xbf16>
    %104 = vector.shape_cast %103 : vector<1x32x32xbf16> to vector<32x32xbf16>
    %cst_97 = arith.constant dense<0.000000e+00> : vector<35x32xf32>
    %105 = tpu.matmul %102, %104, %cst_97 {dimension_numbers = #tpu.dot_dimension_numbers<[1], [0], [0], [1], [0, 0, 1, 1], [], []>} : vector<35x32xbf16>, vector<32x32xbf16>, vector<35x32xf32> -> vector<35x32xf32>
    %c1_98 = arith.constant 1 : index
    %c0_99 = arith.constant 0 : index
    %106 = vector.load %arg27[%c1_98, %c0_99] : memref<37x32xbf16, #tpu.memory_space<vmem>>, vector<35x32xbf16>
    %c1_100 = arith.constant 1 : index
    %c0_101 = arith.constant 0 : index
    %c0_102 = arith.constant 0 : index
    %107 = vector.load %arg12[%c1_100, %c0_101, %c0_102] : memref<3x32x32xbf16, #tpu.memory_space<vmem>>, vector<1x32x32xbf16>
    %108 = vector.shape_cast %107 : vector<1x32x32xbf16> to vector<32x32xbf16>
    %cst_103 = arith.constant dense<0.000000e+00> : vector<35x32xf32>
    %109 = tpu.matmul %106, %108, %cst_103 {dimension_numbers = #tpu.dot_dimension_numbers<[1], [0], [0], [1], [0, 0, 1, 1], [], []>} : vector<35x32xbf16>, vector<32x32xbf16>, vector<35x32xf32> -> vector<35x32xf32>
    %110 = arith.addf %105, %109 : vector<35x32xf32>
    %c2_104 = arith.constant 2 : index
    %c0_105 = arith.constant 0 : index
    %111 = vector.load %arg27[%c2_104, %c0_105] : memref<37x32xbf16, #tpu.memory_space<vmem>>, vector<35x32xbf16>
    %c2_106 = arith.constant 2 : index
    %c0_107 = arith.constant 0 : index
    %c0_108 = arith.constant 0 : index
    %112 = vector.load %arg12[%c2_106, %c0_107, %c0_108] : memref<3x32x32xbf16, #tpu.memory_space<vmem>>, vector<1x32x32xbf16>
    %113 = vector.shape_cast %112 : vector<1x32x32xbf16> to vector<32x32xbf16>
    %cst_109 = arith.constant dense<0.000000e+00> : vector<35x32xf32>
    %114 = tpu.matmul %111, %113, %cst_109 {dimension_numbers = #tpu.dot_dimension_numbers<[1], [0], [0], [1], [0, 0, 1, 1], [], []>} : vector<35x32xbf16>, vector<32x32xbf16>, vector<35x32xf32> -> vector<35x32xf32>
    %115 = arith.addf %110, %114 : vector<35x32xf32>
    %c0_110 = arith.constant 0 : index
    %c0_111 = arith.constant 0 : index
    %116 = vector.load %arg13[%c0_110, %c0_111] : memref<1x32xf32, #tpu.memory_space<vmem>>, vector<1x32xf32>
    %117 = vector.broadcast %116 : vector<1x32xf32> to vector<35x32xf32>
    %118 = arith.addf %115, %117 : vector<35x32xf32>
    %cst_112 = arith.constant 0.000000e+00 : f32
    %119 = vector.broadcast %cst_112 : f32 to vector<35x32xf32>
    %120 = arith.maximumf %118, %119 : vector<35x32xf32>
    %c0_113 = arith.constant 0 : index
    %c0_114 = arith.constant 0 : index
    %121 = vector.load %arg16[%c0_113, %c0_114] : memref<16x35xbf16, #tpu.memory_space<vmem>>, vector<16x35xbf16>
    %122 = arith.truncf %120 : vector<35x32xf32> to vector<35x32xbf16>
    %cst_115 = arith.constant dense<0.000000e+00> : vector<16x32xf32>
    %123 = tpu.matmul %121, %122, %cst_115 {dimension_numbers = #tpu.dot_dimension_numbers<[1], [0], [0], [1], [0, 0, 1, 1], [], []>} : vector<16x35xbf16>, vector<35x32xbf16>, vector<16x32xf32> -> vector<16x32xf32>
    %c0_116 = arith.constant 0 : index
    %c0_117 = arith.constant 0 : index
    %124 = vector.load %arg14[%c0_116, %c0_117] : memref<1x32xf32, #tpu.memory_space<vmem>>, vector<1x32xf32>
    %125 = vector.broadcast %124 : vector<1x32xf32> to vector<16x32xf32>
    %126 = arith.mulf %123, %125 : vector<16x32xf32>
    %c0_118 = arith.constant 0 : index
    %c0_119 = arith.constant 0 : index
    %127 = vector.load %arg15[%c0_118, %c0_119] : memref<1x32xf32, #tpu.memory_space<vmem>>, vector<1x32xf32>
    %128 = vector.broadcast %127 : vector<1x32xf32> to vector<16x32xf32>
    %129 = arith.addf %126, %128 : vector<16x32xf32>
    %cst_120 = arith.constant 0.000000e+00 : bf16
    %130 = vector.broadcast %cst_120 : bf16 to vector<1x32xbf16>
    %c0_121 = arith.constant 0 : index
    %c0_122 = arith.constant 0 : index
    %131 = vector.load %arg28[%c0_121, %c0_122] : memref<21x32xbf16, #tpu.memory_space<vmem>>, vector<1x32xbf16>
    tpu.vector_store %arg28[%c0_121, %c0_122], %130 {strides = array<i32>} : memref<21x32xbf16, #tpu.memory_space<vmem>>, vector<1x32xbf16>,
    %c5 = arith.constant 5 : index
    %c0_123 = arith.constant 0 : index
    %132 = vector.load %arg28[%c5, %c0_123] : memref<21x32xbf16, #tpu.memory_space<vmem>>, vector<1x32xbf16>
    tpu.vector_store %arg28[%c5, %c0_123], %130 {strides = array<i32>} : memref<21x32xbf16, #tpu.memory_space<vmem>>, vector<1x32xbf16>,
    %c10_124 = arith.constant 10 : index
    %c0_125 = arith.constant 0 : index
    %133 = vector.load %arg28[%c10_124, %c0_125] : memref<21x32xbf16, #tpu.memory_space<vmem>>, vector<1x32xbf16>
    tpu.vector_store %arg28[%c10_124, %c0_125], %130 {strides = array<i32>} : memref<21x32xbf16, #tpu.memory_space<vmem>>, vector<1x32xbf16>,
    %c15 = arith.constant 15 : index
    %c0_126 = arith.constant 0 : index
    %134 = vector.load %arg28[%c15, %c0_126] : memref<21x32xbf16, #tpu.memory_space<vmem>>, vector<1x32xbf16>
    tpu.vector_store %arg28[%c15, %c0_126], %130 {strides = array<i32>} : memref<21x32xbf16, #tpu.memory_space<vmem>>, vector<1x32xbf16>,
    %c20 = arith.constant 20 : index
    %c0_127 = arith.constant 0 : index
    %135 = vector.load %arg28[%c20, %c0_127] : memref<21x32xbf16, #tpu.memory_space<vmem>>, vector<1x32xbf16>
    tpu.vector_store %arg28[%c20, %c0_127], %130 {strides = array<i32>} : memref<21x32xbf16, #tpu.memory_space<vmem>>, vector<1x32xbf16>,
    %136 = arith.truncf %129 : vector<16x32xf32> to vector<16x32xbf16>
    %137 = vector.extract_strided_slice %136 {offsets = [0, 0], sizes = [4, 32], strides = [1, 1]} : vector<16x32xbf16> to vector<4x32xbf16>
    %c1_128 = arith.constant 1 : index
    %c0_129 = arith.constant 0 : index
    %138 = vector.load %arg28[%c1_128, %c0_129] : memref<21x32xbf16, #tpu.memory_space<vmem>>, vector<4x32xbf16>
    tpu.vector_store %arg28[%c1_128, %c0_129], %137 {strides = array<i32>} : memref<21x32xbf16, #tpu.memory_space<vmem>>, vector<4x32xbf16>,
    %139 = vector.extract_strided_slice %136 {offsets = [4, 0], sizes = [4, 32], strides = [1, 1]} : vector<16x32xbf16> to vector<4x32xbf16>
    %c6 = arith.constant 6 : index
    %c0_130 = arith.constant 0 : index
    %140 = vector.load %arg28[%c6, %c0_130] : memref<21x32xbf16, #tpu.memory_space<vmem>>, vector<4x32xbf16>
    tpu.vector_store %arg28[%c6, %c0_130], %139 {strides = array<i32>} : memref<21x32xbf16, #tpu.memory_space<vmem>>, vector<4x32xbf16>,
    %141 = vector.extract_strided_slice %136 {offsets = [8, 0], sizes = [4, 32], strides = [1, 1]} : vector<16x32xbf16> to vector<4x32xbf16>
    %c11 = arith.constant 11 : index
    %c0_131 = arith.constant 0 : index
    %142 = vector.load %arg28[%c11, %c0_131] : memref<21x32xbf16, #tpu.memory_space<vmem>>, vector<4x32xbf16>
    tpu.vector_store %arg28[%c11, %c0_131], %141 {strides = array<i32>} : memref<21x32xbf16, #tpu.memory_space<vmem>>, vector<4x32xbf16>,
    %143 = vector.extract_strided_slice %136 {offsets = [12, 0], sizes = [4, 32], strides = [1, 1]} : vector<16x32xbf16> to vector<4x32xbf16>
    %c16 = arith.constant 16 : index
    %c0_132 = arith.constant 0 : index
    %144 = vector.load %arg28[%c16, %c0_132] : memref<21x32xbf16, #tpu.memory_space<vmem>>, vector<4x32xbf16>
    tpu.vector_store %arg28[%c16, %c0_132], %143 {strides = array<i32>} : memref<21x32xbf16, #tpu.memory_space<vmem>>, vector<4x32xbf16>,
    %c0_133 = arith.constant 0 : index
    %c0_134 = arith.constant 0 : index
    %145 = vector.load %arg28[%c0_133, %c0_134] : memref<21x32xbf16, #tpu.memory_space<vmem>>, vector<19x32xbf16>
    %c0_135 = arith.constant 0 : index
    %c0_136 = arith.constant 0 : index
    %c0_137 = arith.constant 0 : index
    %146 = vector.load %arg17[%c0_135, %c0_136, %c0_137] : memref<3x32x32xbf16, #tpu.memory_space<vmem>>, vector<1x32x32xbf16>
    %147 = vector.shape_cast %146 : vector<1x32x32xbf16> to vector<32x32xbf16>
    %cst_138 = arith.constant dense<0.000000e+00> : vector<19x32xf32>
    %148 = tpu.matmul %145, %147, %cst_138 {dimension_numbers = #tpu.dot_dimension_numbers<[1], [0], [0], [1], [0, 0, 1, 1], [], []>} : vector<19x32xbf16>, vector<32x32xbf16>, vector<19x32xf32> -> vector<19x32xf32>
    %c1_139 = arith.constant 1 : index
    %c0_140 = arith.constant 0 : index
    %149 = vector.load %arg28[%c1_139, %c0_140] : memref<21x32xbf16, #tpu.memory_space<vmem>>, vector<19x32xbf16>
    %c1_141 = arith.constant 1 : index
    %c0_142 = arith.constant 0 : index
    %c0_143 = arith.constant 0 : index
    %150 = vector.load %arg17[%c1_141, %c0_142, %c0_143] : memref<3x32x32xbf16, #tpu.memory_space<vmem>>, vector<1x32x32xbf16>
    %151 = vector.shape_cast %150 : vector<1x32x32xbf16> to vector<32x32xbf16>
    %cst_144 = arith.constant dense<0.000000e+00> : vector<19x32xf32>
    %152 = tpu.matmul %149, %151, %cst_144 {dimension_numbers = #tpu.dot_dimension_numbers<[1], [0], [0], [1], [0, 0, 1, 1], [], []>} : vector<19x32xbf16>, vector<32x32xbf16>, vector<19x32xf32> -> vector<19x32xf32>
    %153 = arith.addf %148, %152 : vector<19x32xf32>
    %c2_145 = arith.constant 2 : index
    %c0_146 = arith.constant 0 : index
    %154 = vector.load %arg28[%c2_145, %c0_146] : memref<21x32xbf16, #tpu.memory_space<vmem>>, vector<19x32xbf16>
    %c2_147 = arith.constant 2 : index
    %c0_148 = arith.constant 0 : index
    %c0_149 = arith.constant 0 : index
    %155 = vector.load %arg17[%c2_147, %c0_148, %c0_149] : memref<3x32x32xbf16, #tpu.memory_space<vmem>>, vector<1x32x32xbf16>
    %156 = vector.shape_cast %155 : vector<1x32x32xbf16> to vector<32x32xbf16>
    %cst_150 = arith.constant dense<0.000000e+00> : vector<19x32xf32>
    %157 = tpu.matmul %154, %156, %cst_150 {dimension_numbers = #tpu.dot_dimension_numbers<[1], [0], [0], [1], [0, 0, 1, 1], [], []>} : vector<19x32xbf16>, vector<32x32xbf16>, vector<19x32xf32> -> vector<19x32xf32>
    %158 = arith.addf %153, %157 : vector<19x32xf32>
    %c0_151 = arith.constant 0 : index
    %c0_152 = arith.constant 0 : index
    %159 = vector.load %arg18[%c0_151, %c0_152] : memref<1x32xf32, #tpu.memory_space<vmem>>, vector<1x32xf32>
    %160 = vector.broadcast %159 : vector<1x32xf32> to vector<19x32xf32>
    %161 = arith.addf %158, %160 : vector<19x32xf32>
    %cst_153 = arith.constant 0.000000e+00 : f32
    %162 = vector.broadcast %cst_153 : f32 to vector<19x32xf32>
    %163 = arith.maximumf %161, %162 : vector<19x32xf32>
    %c0_154 = arith.constant 0 : index
    %c0_155 = arith.constant 0 : index
    %164 = vector.load %arg21[%c0_154, %c0_155] : memref<8x19xbf16, #tpu.memory_space<vmem>>, vector<8x19xbf16>
    %165 = arith.truncf %163 : vector<19x32xf32> to vector<19x32xbf16>
    %cst_156 = arith.constant dense<0.000000e+00> : vector<8x32xf32>
    %166 = tpu.matmul %164, %165, %cst_156 {dimension_numbers = #tpu.dot_dimension_numbers<[1], [0], [0], [1], [0, 0, 1, 1], [], []>} : vector<8x19xbf16>, vector<19x32xbf16>, vector<8x32xf32> -> vector<8x32xf32>
    %c0_157 = arith.constant 0 : index
    %c0_158 = arith.constant 0 : index
    %167 = vector.load %arg19[%c0_157, %c0_158] : memref<1x32xf32, #tpu.memory_space<vmem>>, vector<1x32xf32>
    %168 = vector.broadcast %167 : vector<1x32xf32> to vector<8x32xf32>
    %169 = arith.mulf %166, %168 : vector<8x32xf32>
    %c0_159 = arith.constant 0 : index
    %c0_160 = arith.constant 0 : index
    %170 = vector.load %arg20[%c0_159, %c0_160] : memref<1x32xf32, #tpu.memory_space<vmem>>, vector<1x32xf32>
    %171 = vector.broadcast %170 : vector<1x32xf32> to vector<8x32xf32>
    %172 = arith.addf %169, %171 : vector<8x32xf32>
    %173 = arith.truncf %172 : vector<8x32xf32> to vector<8x32xbf16>
    %c0_161 = arith.constant 0 : index
    %c0_162 = arith.constant 0 : index
    %174 = vector.load %arg22[%c0_161, %c0_162] : memref<32x16xbf16, #tpu.memory_space<vmem>>, vector<32x16xbf16>
    %cst_163 = arith.constant dense<0.000000e+00> : vector<8x16xf32>
    %175 = tpu.matmul %173, %174, %cst_163 {dimension_numbers = #tpu.dot_dimension_numbers<[1], [0], [0], [1], [0, 0, 1, 1], [], []>} : vector<8x32xbf16>, vector<32x16xbf16>, vector<8x16xf32> -> vector<8x16xf32>
    %c0_164 = arith.constant 0 : index
    %c0_165 = arith.constant 0 : index
    %176 = vector.load %arg23[%c0_164, %c0_165] : memref<1x16xf32, #tpu.memory_space<vmem>>, vector<1x16xf32>
    %177 = vector.broadcast %176 : vector<1x16xf32> to vector<8x16xf32>
    %178 = arith.addf %175, %177 : vector<8x16xf32>
    %179 = math.tanh %178 : vector<8x16xf32>
    %c0_166 = arith.constant 0 : index
    %c0_167 = arith.constant 0 : index
    %180 = vector.load %arg24[%c0_166, %c0_167] : memref<8x16xf32, #tpu.memory_space<vmem>>, vector<8x16xf32>
    tpu.vector_store %arg24[%c0_166, %c0_167], %179 {strides = array<i32>} : memref<8x16xf32, #tpu.memory_space<vmem>>, vector<8x16xf32>,
    return
  }
  func.func @transform_0(%arg0: i32) -> (i32, i32) {
    %c0_i32 = arith.constant 0 : i32
    %c0_i32_0 = arith.constant 0 : i32
    return %arg0, %c0_i32 : i32, i32
  }
  func.func @transform_1(%arg0: i32) -> (i32, i32, i32) {
    %c0_i32 = arith.constant 0 : i32
    %c0_i32_0 = arith.constant 0 : i32
    %c0_i32_1 = arith.constant 0 : i32
    %c0_i32_2 = arith.constant 0 : i32
    return %c0_i32, %c0_i32_0, %c0_i32_1 : i32, i32, i32
  }
  func.func @transform_2(%arg0: i32) -> (i32, i32) {
    %c0_i32 = arith.constant 0 : i32
    %c0_i32_0 = arith.constant 0 : i32
    %c0_i32_1 = arith.constant 0 : i32
    return %c0_i32, %c0_i32_0 : i32, i32
  }
  func.func @transform_3(%arg0: i32) -> (i32, i32) {
    %c0_i32 = arith.constant 0 : i32
    %c0_i32_0 = arith.constant 0 : i32
    %c0_i32_1 = arith.constant 0 : i32
    return %c0_i32, %c0_i32_0 : i32, i32
  }
  func.func @transform_4(%arg0: i32) -> (i32, i32) {
    %c0_i32 = arith.constant 0 : i32
    %c0_i32_0 = arith.constant 0 : i32
    %c0_i32_1 = arith.constant 0 : i32
    return %c0_i32, %c0_i32_0 : i32, i32
  }
  func.func @transform_5(%arg0: i32) -> (i32, i32) {
    %c0_i32 = arith.constant 0 : i32
    %c0_i32_0 = arith.constant 0 : i32
    %c0_i32_1 = arith.constant 0 : i32
    return %c0_i32, %c0_i32_0 : i32, i32
  }
  func.func @transform_6(%arg0: i32) -> (i32, i32, i32) {
    %c0_i32 = arith.constant 0 : i32
    %c0_i32_0 = arith.constant 0 : i32
    %c0_i32_1 = arith.constant 0 : i32
    %c0_i32_2 = arith.constant 0 : i32
    return %c0_i32, %c0_i32_0, %c0_i32_1 : i32, i32, i32
  }
  func.func @transform_7(%arg0: i32) -> (i32, i32) {
    %c0_i32 = arith.constant 0 : i32
    %c0_i32_0 = arith.constant 0 : i32
    %c0_i32_1 = arith.constant 0 : i32
    return %c0_i32, %c0_i32_0 : i32, i32
  }
  func.func @transform_8(%arg0: i32) -> (i32, i32) {
    %c0_i32 = arith.constant 0 : i32
    %c0_i32_0 = arith.constant 0 : i32
    %c0_i32_1 = arith.constant 0 : i32
    return %c0_i32, %c0_i32_0 : i32, i32
  }
  func.func @transform_9(%arg0: i32) -> (i32, i32) {
    %c0_i32 = arith.constant 0 : i32
    %c0_i32_0 = arith.constant 0 : i32
    %c0_i32_1 = arith.constant 0 : i32
    return %c0_i32, %c0_i32_0 : i32, i32
  }
  func.func @transform_10(%arg0: i32) -> (i32, i32) {
    %c0_i32 = arith.constant 0 : i32
    %c0_i32_0 = arith.constant 0 : i32
    %c0_i32_1 = arith.constant 0 : i32
    return %c0_i32, %c0_i32_0 : i32, i32
  }
  func.func @transform_11(%arg0: i32) -> (i32, i32, i32) {
    %c0_i32 = arith.constant 0 : i32
    %c0_i32_0 = arith.constant 0 : i32
    %c0_i32_1 = arith.constant 0 : i32
    %c0_i32_2 = arith.constant 0 : i32
    return %c0_i32, %c0_i32_0, %c0_i32_1 : i32, i32, i32
  }
  func.func @transform_12(%arg0: i32) -> (i32, i32) {
    %c0_i32 = arith.constant 0 : i32
    %c0_i32_0 = arith.constant 0 : i32
    %c0_i32_1 = arith.constant 0 : i32
    return %c0_i32, %c0_i32_0 : i32, i32
  }
  func.func @transform_13(%arg0: i32) -> (i32, i32) {
    %c0_i32 = arith.constant 0 : i32
    %c0_i32_0 = arith.constant 0 : i32
    %c0_i32_1 = arith.constant 0 : i32
    return %c0_i32, %c0_i32_0 : i32, i32
  }
  func.func @transform_14(%arg0: i32) -> (i32, i32) {
    %c0_i32 = arith.constant 0 : i32
    %c0_i32_0 = arith.constant 0 : i32
    %c0_i32_1 = arith.constant 0 : i32
    return %c0_i32, %c0_i32_0 : i32, i32
  }
  func.func @transform_15(%arg0: i32) -> (i32, i32) {
    %c0_i32 = arith.constant 0 : i32
    %c0_i32_0 = arith.constant 0 : i32
    %c0_i32_1 = arith.constant 0 : i32
    return %c0_i32, %c0_i32_0 : i32, i32
  }
  func.func @transform_16(%arg0: i32) -> (i32, i32, i32) {
    %c0_i32 = arith.constant 0 : i32
    %c0_i32_0 = arith.constant 0 : i32
    %c0_i32_1 = arith.constant 0 : i32
    %c0_i32_2 = arith.constant 0 : i32
    return %c0_i32, %c0_i32_0, %c0_i32_1 : i32, i32, i32
  }
  func.func @transform_17(%arg0: i32) -> (i32, i32) {
    %c0_i32 = arith.constant 0 : i32
    %c0_i32_0 = arith.constant 0 : i32
    %c0_i32_1 = arith.constant 0 : i32
    return %c0_i32, %c0_i32_0 : i32, i32
  }
  func.func @transform_18(%arg0: i32) -> (i32, i32) {
    %c0_i32 = arith.constant 0 : i32
    %c0_i32_0 = arith.constant 0 : i32
    %c0_i32_1 = arith.constant 0 : i32
    return %c0_i32, %c0_i32_0 : i32, i32
  }
  func.func @transform_19(%arg0: i32) -> (i32, i32) {
    %c0_i32 = arith.constant 0 : i32
    %c0_i32_0 = arith.constant 0 : i32
    %c0_i32_1 = arith.constant 0 : i32
    return %c0_i32, %c0_i32_0 : i32, i32
  }
  func.func @transform_20(%arg0: i32) -> (i32, i32) {
    %c0_i32 = arith.constant 0 : i32
    %c0_i32_0 = arith.constant 0 : i32
    %c0_i32_1 = arith.constant 0 : i32
    return %c0_i32, %c0_i32_0 : i32, i32
  }
  func.func @transform_21(%arg0: i32) -> (i32, i32) {
    %c0_i32 = arith.constant 0 : i32
    %c0_i32_0 = arith.constant 0 : i32
    %c0_i32_1 = arith.constant 0 : i32
    return %c0_i32, %c0_i32_0 : i32, i32
  }
  func.func @transform_22(%arg0: i32) -> (i32, i32) {
    %c0_i32 = arith.constant 0 : i32
    %c0_i32_0 = arith.constant 0 : i32
    %c0_i32_1 = arith.constant 0 : i32
    return %c0_i32, %c0_i32_0 : i32, i32
  }
  func.func @transform_23(%arg0: i32) -> (i32, i32) {
    %c0_i32 = arith.constant 0 : i32
    %c0_i32_0 = arith.constant 0 : i32
    return %arg0, %c0_i32 : i32, i32
  }
}

</mosaic_0001>

<bundles_post_ra>
// kernel: downsample_encoder.1
= control target key start
LH: loop header
LB: loop body
LE: loop exit
PB: predicated region body
PF: predicated region fallthrough
CT: control target
= control target key end

     0   :  { %s4000_s0 = inlined_call_operand.vmem [shape: f32[256,16], index: 0, kind: input, shape index: {}]   ;;  %s4001_s1 = inlined_call_operand.vmem [shape: bf16[3,16,16], index: 1, kind: input, shape index: {}]   ;;  %s4002_s2 = inlined_call_operand.vmem [shape: f32[1,16], index: 2, kind: input, shape index: {}]   ;;  %s4003_s3 = inlined_call_operand.vmem [shape: f32[1,16], index: 3, kind: input, shape index: {}]   ;;  %s4004_s4 = inlined_call_operand.vmem [shape: f32[1,16], index: 4, kind: input, shape index: {}]   ;;  %s4005_s5 = inlined_call_operand.vmem [shape: bf16[64,131], index: 5, kind: input, shape index: {}]   ;;  %s4006_s6 = inlined_call_operand.vmem [shape: bf16[3,16,32], index: 6, kind: input, shape index: {}]   ;;  %s4007_s7 = inlined_call_operand.vmem [shape: f32[1,32], index: 7, kind: input, shape index: {}]   ;;  %s4008_s8 = inlined_call_operand.vmem [shape: f32[1,32], index: 8, kind: input, shape index: {}]   ;;  %s4009_s9 = inlined_call_operand.vmem [shape: f32[1,32], index: 9, kind: input, shape index: {}]   ;;  %s4010_s10 = inlined_call_operand.vmem [shape: bf16[32,67], index: 10, kind: input, shape index: {}]   ;;  %s4011_s11 = inlined_call_operand.vmem [shape: bf16[3,32,32], index: 11, kind: input, shape index: {}]   ;;  %s4012_s12 = inlined_call_operand.vmem [shape: f32[1,32], index: 12, kind: input, shape index: {}]   ;;  %s4013_s13 = inlined_call_operand.vmem [shape: f32[1,32], index: 13, kind: input, shape index: {}]   ;;  %s4014_s14 = inlined_call_operand.vmem [shape: f32[1,32], index: 14, kind: input, shape index: {}]   ;;  %s4015_s15 = inlined_call_operand.vmem [shape: bf16[16,35], index: 15, kind: input, shape index: {}]   ;;  %s4016_s16 = inlined_call_operand.vmem [shape: bf16[3,32,32], index: 16, kind: input, shape index: {}]   ;;  %s4017_s17 = inlined_call_operand.vmem [shape: f32[1,32], index: 17, kind: input, shape index: {}]   ;;  %s4018_s18 = inlined_call_operand.vmem [shape: f32[1,32], index: 18, kind: input, shape index: {}]   ;;  %s4019_s19 = inlined_call_operand.vmem [shape: f32[1,32], index: 19, kind: input, shape index: {}]   ;;  %s4020_s20 = inlined_call_operand.vmem [shape: bf16[8,19], index: 20, kind: input, shape index: {}]   ;;  %s4021_s21 = inlined_call_operand.vmem [shape: bf16[32,16], index: 21, kind: input, shape index: {}]   ;;  %s4022_s22 = inlined_call_operand.vmem [shape: f32[1,16], index: 22, kind: input, shape index: {}]   ;;  %s4023_s23 = inlined_call_operand.hbm [shape: f32[16,16], index: 23, kind: output, shape index: {}]  }
   0x1   :  { %4053 = sst [smem:[#allocation15_spill]] %s4000_s0 }
   0x2   :  { %4054 = sst [smem:[#allocation16_spill]] %s4001_s1 }
   0x3   :  { %4055 = sst [smem:[#allocation17_spill]] %s4002_s2 }
   0x4   :  { %4056 = sst [smem:[#allocation18_spill]] %s4003_s3 }
   0x5   :  { %4057 = sst [smem:[#allocation19_spill]] %s4004_s4 }
   0x6   :  { %4058 = sst [smem:[#allocation20_spill]] %s4005_s5 }
   0x7   :  { %4059 = sst [smem:[#allocation21_spill]] %s4006_s6 }
   0x8   :  { %4060 = sst [smem:[#allocation22_spill]] %s4007_s7 }
   0x9   :  { %4061 = sst [smem:[#allocation23_spill]] %s4008_s8 }
   0xa   :  { %28 = vsyncpa [#allocation7], 0 }
   0xb   :  { %30 = vsyncpa [#allocation7 + $0x1], 0  ;;  %s3333_s4 = smov 0   ;;  %s3335_s30 = smov 0  }
   0xc   :  { %s3337_s24 = smov 0   ;;  %s3339_s25 = smov 0  }
   0xd LB: > { %4062 = sst [smem:[#allocation9_spill]] %s3198_s4  ;;  %s3354_s5 = sadd.s32 4294967295, %s3210_s25   ;;  %s3210_s25 = sphi %s3339_s25, %s4162_s25   ;;  %s3206_s24 = sphi %s3337_s24, %s4164_s24   ;;  %s3202_s30 = sphi %s3335_s30, %s4166_s30   ;;  %s3198_s4 = sphi %s3333_s4, %s4165_s4  }
   0xe   : > { %4063 = sst [smem:[#allocation10_spill]] %s3206_s24  ;;  %s2748_s1 = sadd.s32 4294967294, %s3210_s25  }
   0xf   : > { %4064 = sst [smem:[#allocation11_spill]] %s3210_s25  ;;  %s3358_s26 = sadd.s32 1, %s3210_s25  }
  0x10   : > { %4065 = sst [smem:[#allocation12_spill]] %s3358_s26  ;;  %s531_s2 = sadd.s32 1, %s3206_s24 }
  0x11   : > { %s528_s6 = ssub.s32 %s3210_s25, %s3358_s26  ;;  %p541_p0 = scmp.ne.s32.totalorder %s3206_s24, %s3202_s30 }
  0x12   : > { %p529_p1 = scmp.eq.s32.totalorder %s528_s6, 0  ;;  %p542_p2 = scmp.eq.s32.totalorder %s3354_s5, 1 }
  0x13   : > { %p547_p3 = scmp.ne.s32.totalorder %s3202_s30, %s3198_s4  ;;  %p548_p4 = scmp.eq.s32.totalorder %s2748_s1, 1 }
  0x14   : > { %s3369_s27 = scalar_select %p529_p1, %s3206_s24, %s531_s2  }
  0x15   : > { %p3371_p5 = por %p542_p2, %p541_p0  ;;  %p3375_p6 = por %p548_p4, %p547_p3 }
  0x16   : > { %4066 = sst [smem:[#allocation13_spill]] %s3369_s27  ;;  %p2751_p7 = scmp.ge.s32.totalorder %s3210_s25, 1 }
  0x17   : > { %s4068_s28 = scalar_select %p3375_p6, 1, 0 }
  0x18   : > { %p641_p8 = scmp.lt.s32.totalorder %s3210_s25, 3 }
  0x19   : > { %4069 = sst [smem:[#allocation14_spill]] %s4068_s28 }
  0x1a   : > { %p642_p9 = pnand %p2751_p7, %p641_p8 }
  0x1b   : > { %s4070_s0 = sld [smem:[#allocation16_spill]] (!%p642_p9)  ;;  %s2753_s1 = sshll.u32 (!%p642_p9), %s3354_s5, 4 }
  0x1c   : > { %645 = sbr.rel (%p642_p9) target bundleno = 1810 (0x712), region = 112  ;;  %p706_p10 = scmp.lt.s32.totalorder (!%p642_p9), %s2753_s1, 31 }
  0x1d   : > { %s4075_s28 = sld [smem:[#allocation15_spill]] (!%p642_p9) }
  0x1e   : > { %s4111_s26 = sld [smem:[#allocation17_spill]] (!%p642_p9) }
  0x1f   : > { %s4115_s3 = sld [smem:[#allocation21_spill]] (!%p642_p9) }
  0x20   : > { %s4117_s6 = sld [smem:[#allocation19_spill]] (!%p642_p9) }
  0x21   : > { %v3025_v0 = vld [vmem:[%s4070_s0] sm:$0xff]  ;;  %vm4037_vm0 = vcmask 122880   ;;  %vm4033_vm1 = vsmask.f32 256  ;;  %vm4032_vm3 = vsmask.f32 7938 }
  0x22   : > { %vm3387_vm2 = vmand %vm4037_vm0, %vm4033_vm1  ;;  %v731_v2 = vld [vmem:[#allocation2] sm:$0x1]  ;;  %1200 = vmatpush.bf16.msra.mxu1 %v3025_v0  ;;  %v736_v5 = vld [vmem:[#allocation2 + $0x10] sm:$0x1]  ;;  %s4168_s1 = smov (!%p706_p10, %s2753_s1), 31  ;;  %vm4040_vm6 = vcmask 125952  }
  0x23   : > { %v732_v3 = vsel %vm3387_vm2, 0, %v731_v2  ;;  %vm3395_vm4 = vmand %vm4037_vm0, %vm4032_vm3  ;;  %v3027_v6 = vld [vmem:[%s4070_s0 + $0x10] sm:$0xff]  ;;  %v3026_v8 = vld [vmem:[%s4070_s0 + $0x8] sm:$0xff]  ;;  %vm772_vm5 = vsmask.f32 4368  ;;  %s2754_s27 = sshll.u32 %s4168_s1, 3 }
  0x24   : > { %733 = vst [vmem:[#allocation2] sm:$0x1] %v732_v3  ;;  %v737_v7 = vsel %vm3395_vm4, 0, %v736_v5  ;;  %1315 = vmatpush.bf16.msra.mxu2 %v3027_v6  ;;  %1123 = vmatpush.bf16.msra.mxu0 %v3026_v8  ;;  %s3410_s4 = scalar_lea.vmem %s4075_s28, %s2754_s27  ;;  %vm4034_vm7 = vcmask 1040384   ;;  %vm831_vm8 = vcmask 1044484   ;;  %vm4038_vm9 = vcmask 125953   ;;  %vm3420_vm10 = vmor %vm4033_vm1, %vm772_vm5 }
  0x25   : > { %738 = vst [vmem:[#allocation2 + $0x10] sm:$0x1] %v737_v7  ;;  %v712_v9 = vld [vmem:[%s3410_s4] sm:$0xff]  ;;  %v713_v10 = vld [vmem:[%s3410_s4 + $0x8] sm:$0xff]  ;;  %v714_v11 = vld [vmem:[%s3410_s4 + $0x10] sm:$0xff]  ;;  %vm1088_vm13 = vcmask 130048  }
  0x26   : > { %v715_v12 = vld [vmem:[%s3410_s4 + $0x18] sm:$0xff]  ;;  %v756_v13 = vpack.c.bf16 %v712_v9, %v712_v9  ;;  %v757_v14 = vpack.c.bf16 %v713_v10, %v713_v10  ;;  %v758_v15 = vpack.c.bf16 %v714_v11, %v714_v11  ;;  %v716_v16 = vld [vmem:[%s3410_s4 + $0x20] sm:$0xff]  ;;  %v717_v17 = vld [vmem:[%s3410_s4 + $0x28] sm:$0xff]  ;;  %vm4035_vm14 = vcmask 123905   ;;  %s4112_s1 = sld [smem:[#allocation20_spill]] }
  0x27   : > { %v759_v18 = vpack.c.bf16 %v715_v12, %v715_v12  ;;  %v760_v19 = vpack.c.bf16 %v716_v16, %v716_v16  ;;  %v761_v20 = vpack.c.bf16 %v717_v17, %v717_v17  ;;  %v718_v34 = vld [vmem:[%s3410_s4 + $0x30] sm:$0xff]  ;;  %vm3427_vm11 = vmand %vm4040_vm6, %vm4032_vm3  ;;  %v719_v45 = vld [vmem:[%s3410_s4 + $0x38] sm:$0xff]  ;;  %vm4043_vm15 = vsmask.f32 1280  ;;  %s4116_s27 = sld [smem:[#allocation18_spill]] }
  0x28   : > { %v775_v21 = vshrl.u32 %v756_v13, 16  ;;  %v778_v22 = vshll.u32 %v756_v13, 16  ;;  %v783_v23 = vshrl.u32 %v757_v14, 16  ;;  %v786_v24 = vshll.u32 %v757_v14, 16  ;;  %vm3439_vm12 = vmor %vm4034_vm7, %vm831_vm8  ;;  %v720_v3 = vld [vmem:[%s3410_s4 + $0x40] sm:$0xff]  ;;  %v721_v11 = vld [vmem:[%s3410_s4 + $0x48] sm:$0xff] }
  0x29   : > { %v792_v25 = vshrl.u32 %v758_v15, 16  ;;  %v795_v26 = vshll.u32 %v758_v15, 16  ;;  %v801_v27 = vshrl.u32 %v759_v18, 16  ;;  %v804_v28 = vshll.u32 %v759_v18, 16  ;;  %vm3466_vm8 = vmand %vm4035_vm14, %vm4043_vm15  ;;  %v742_v13 = vld [vmem:[#allocation2 + $0x20] sm:$0x2] }
  0x2a   : > { %v777_v30 = vrot.slane %v775_v21, 7  ;;  %v785_v31 = vrot.slane %v783_v23, 7  ;;  %v833_v33 = vrot.slane %v760_v19, 7  ;;  %v835_v39 = vrot.slane %v761_v20, 7  ;;  %s4148_s8 = sld [smem:[#allocation23_spill]] }
  0x2b   : > { %v816_v32 = vld [vmem:[#allocation2] sm:$0xf]  ;;  %v794_v35 = vrot.slane %v792_v25, 7  ;;  %v803_v36 = vrot.slane %v801_v27, 7  ;;  %v762_v40 = vpack.c.bf16 %v718_v34, %v718_v34  ;;  %v763_v54 = vpack.c.bf16 %v719_v45, %v719_v45 }
  0x2c   : > { %v823_v38 = vld [vmem:[#allocation2 + $0x10] sm:$0x1]  ;;  %v780_v41 = vor.u32 %v778_v22, %v777_v30  ;;  %v781_v42 = vrot.slane %v777_v30, 4  ;;  %v788_v43 = vor.u32 %v786_v24, %v785_v31  ;;  %v790_v44 = vrot.slane %v785_v31, 4  ;;  %850 = vst.msk [vmem:[#allocation2 + $0x10] sm:$0xe] %vm4038_vm9, %v833_v33 }
  0x2d   : > { %v797_v46 = vor.u32 %v795_v26, %v794_v35  ;;  %v799_v47 = vrot.slane %v794_v35, 4  ;;  %v806_v48 = vor.u32 %v804_v28, %v803_v36  ;;  %v808_v49 = vrot.slane %v803_v36, 4 }
  0x2e   : > { %v789_v50 = vsel %vm3420_vm10, %v781_v42, %v788_v43  ;;  %v817_v51 = vsel %vm3427_vm11, %v780_v41, %v816_v32  ;;  %v834_v53 = vrot.slane %v833_v33, 4  ;;  %v837_v57 = vrot.slane %v835_v39, 4 }
  0x2f   : > { %v798_v55 = vsel %vm3420_vm10, %v790_v44, %v797_v46  ;;  %v807_v56 = vsel %vm3420_vm10, %v799_v47, %v806_v48  ;;  %818 = vst [vmem:[#allocation2] sm:$0xf] %v817_v51  ;;  %v824_v58 = vsel %vm3387_vm2, %v808_v49, %v823_v38  ;;  %v838_v59 = vrot.slane %v762_v40, 7  ;;  %v722_v47 = vld [vmem:[%s3410_s4 + $0x50] sm:$0xff]  ;;  %v723_v51 = vld [vmem:[%s3410_s4 + $0x58] sm:$0xff] }
  0x30   : > { %820 = vst.msk [vmem:[#allocation2 + $0x4] sm:$0xf] %vm4040_vm6, %v789_v50  ;;  %v841_v60 = vrot.slane %v763_v54, 7  ;;  %v836_v61 = vsel %vm3439_vm12, %v834_v53, %v835_v39  ;;  %v764_v7 = vpack.c.bf16 %v720_v3, %v720_v3  ;;  %vm4036_vm5 = vcmask 1046528  }
  0x31   : > { %821 = vst.msk [vmem:[#allocation2 + $0x8] sm:$0xf] %vm4040_vm6, %v798_v55  ;;  %v839_v62 = vsel %vm3439_vm12, %v837_v57, %v838_v59  ;;  %v840_v63 = vrot.slane %v838_v59, 4  ;;  %v743_v15 = vsel %vm3466_vm8, 0, %v742_v13  ;;  %v765_v16 = vpack.c.bf16 %v721_v11, %v721_v11 }
  0x32   : > { %822 = vst.msk [vmem:[#allocation2 + $0xc] sm:$0xf] %vm4040_vm6, %v807_v56  ;;  %v859_v17 = vshrl.u32 %v764_v7, 16  ;;  %v862_v18 = vshll.u32 %v764_v7, 16  ;;  %vm4042_vm3 = vsmask.f32 7424  ;;  %v766_v49 = vpack.c.bf16 %v722_v47, %v722_v47 }
  0x33   : > { %825 = vst [vmem:[#allocation2 + $0x10] sm:$0x1] %v824_v58  ;;  %v842_v0 = vsel %vm3439_vm12, %v840_v63, %v841_v60  ;;  %vm4039_vm1 = vsmask.f32 7942  ;;  %v868_v26 = vshrl.u32 %v765_v16, 16  ;;  %v871_v27 = vshll.u32 %v765_v16, 16 }
  0x34   : > { %851 = vst.msk [vmem:[#allocation2 + $0x14] sm:$0xf] %vm4040_vm6, %v836_v61  ;;  %v861_v23 = vrot.slane %v859_v17, 6  ;;  %v864_v25 = vrot.slane %v862_v18, 7  ;;  %vm3477_vm7 = vmand %vm4038_vm9, %vm4039_vm1  ;;  %v4084_v35 = vmov 0  ;;  %v843_v36 = vrot.slane %v841_v60, 4 }
  0x35   : > { %852 = vst.msk [vmem:[#allocation2 + $0x18] sm:$0xf] %vm4040_vm6, %v839_v62  ;;  %v870_v32 = vrot.slane %v868_v26, 6  ;;  %v873_v33 = vrot.slane %v871_v27, 7  ;;  %v4085_v35 = vsel %vm3477_vm7, 4294967295, %v4084_v35  ;;  %v4086_v39 = vmov 0 }
  0x36   : > { %v3077_v2 = vld [vmem:[#allocation2] sm:$0xe]  ;;  %853 = vst.msk [vmem:[#allocation2 + $0x1c] sm:$0xf] %vm4040_vm6, %v842_v0  ;;  %v865_v31 = vor.u32 %v864_v25, %v861_v23  ;;  %vm856_vm14 = vsmask.f32 5392  ;;  %v767_v54 = vpack.c.bf16 %v723_v51, %v723_v51 }
  0x37   : > { %v3061_v5 = vld [vmem:[#allocation2] sm:$0xff]   ;;  %744 = vst [vmem:[#allocation2 + $0x20] sm:$0x2] %v743_v15  ;;  %v874_v41 = vor.u32 %v873_v33, %v870_v32  ;;  %v878_v55 = vshrl.u32 %v766_v49, 16  ;;  %v881_v56 = vshll.u32 %v766_v49, 16  ;;  %vm4092_vm9 = vcmask 1046528  }
  0x38   : > { %v3076_v6 = vld [vmem:[#allocation2] sm:$0xf0]  ;;  %v1012_v8 = vshrl.u32 %v3061_v5, 16  ;;  %v1014_v9 = vshll.u32 %v3061_v5, 16  ;;  %2802 = vmatmul.msk.bf16.vlgmr.msra.gmra.mxu1 %vm1088_vm13, %v3061_v5  ;;  %v866_v40 = vrot.slane %v865_v31, 4  ;;  %v888_v60 = vshrl.u32 %v767_v54, 16 }
  0x39   : > { %v3078_v10 = vor.u32 %v3077_v2, %v3076_v6  ;;  %v3018_v14 = vld [vmem:[#allocation2 + $0x8] sm:$0xff]  ;;  %855 = vst.msk [vmem:[#allocation2 + $0x20] sm:$0x1] %vm4037_vm0, %v843_v36  ;;  %v880_v58 = vrot.slane %v878_v55, 6  ;;  %v883_v59 = vrot.slane %v881_v56, 7  ;;  %v891_v61 = vshll.u32 %v767_v54, 16 }
  0x3a   : > { %v1016_v19 = vrot.slane %v1014_v9, 1  ;;  %v1259_v21 = vrot.slane %v3018_v14, 1  ;;  %v1019_v22 = vshll.u32 %v3018_v14, 16  ;;  %v1023_v45 = vshrl.u32 %v3018_v14, 16  ;;  %v747_v15 = vld [vmem:[#allocation2 + $0x30] sm:$0x2] }
  0x3b   : > { %v1258_v20 = vrot.slane %v3078_v10, 1  ;;  %v3019_v38 = vld [vmem:[#allocation2 + $0x10] sm:$0xff]  ;;  %v884_v63 = vor.u32 %v883_v59, %v880_v58  ;;  %v890_v0 = vrot.slane %v888_v60, 6  ;;  %v893_v2 = vrot.slane %v891_v61, 7  ;;  %v727_v47 = vld [vmem:[%s3410_s4 + $0x78] sm:$0xff] }
  0x3c   : > { %v1017_v24 = vor.u32 %v1016_v19, %v1012_v8  ;;  %v1021_v30 = vrot.slane %v1019_v22, 1  ;;  %v1027_v46 = vshll.u32 %v3019_v38, 16  ;;  %v1261_v48 = vrot.slane %v3019_v38, 1  ;;  %v724_v19 = vld [vmem:[%s3410_s4 + $0x60] sm:$0xff]  ;;  %v725_v22 = vld [vmem:[%s3410_s4 + $0x68] sm:$0xff] }
  0x3d   : > { %v1260_v28 = vsel %vm4036_vm5, %v1258_v20, %v1259_v21  ;;  %vm3483_vm5 = vmor %vm4043_vm15, %vm856_vm14  ;;  %vm4088_vm14 = vcmask 1046528   ;;  %v876_v3 = vrot.slane %v874_v41, 4  ;;  %v886_v5 = vrot.slane %v884_v63, 4  ;;  %v3020_v7 = vld [vmem:[#allocation2 + $0x18] sm:$0xff] }
  0x3e   : > { %2817 = vmatmul.msk.bf16.vlgmr.msra.gmra.mxu2 %vm1088_vm13, %v1260_v28  ;;  %v1022_v34 = vsel %vm4042_vm3, %v1017_v24, %v1021_v30  ;;  %v4087_v39 = vsel %vm3483_vm5, 4294967295, %v4086_v39  ;;  %v904_v42 = vld [vmem:[#allocation2 + $0x20] sm:$0xe]  ;;  %v875_v44 = vsel %vm3483_vm5, %v866_v40, %v874_v41  ;;  %v1025_v50 = vor.u32 %v1023_v45, %v1021_v30 }
  0x3f   : > { %2789 = vmatmul.msk.bf16.vlgmr.msra.gmra.mxu0 %vm1088_vm13, %v1022_v34  ;;  %v905_v43 = vsel %vm3477_vm7, %v865_v31, %v904_v42  ;;  %907 = vst.msk [vmem:[#allocation2 + $0x24] sm:$0xf] %vm4040_vm6, %v875_v44  ;;  %v1029_v53 = vrot.slane %v1027_v46, 1  ;;  %v1262_v57 = vsel %vm4088_vm14, %v1259_v21, %v1261_v48  ;;  %v894_v6 = vor.u32 %v893_v2, %v890_v0  ;;  %v726_v44 = vld [vmem:[%s3410_s4 + $0x70] sm:$0xff]  ;;  %s4137_s4 = sld [smem:[#allocation22_spill]] }
  0x40   : > { %906 = vst [vmem:[#allocation2 + $0x20] sm:$0xe] %v905_v43  ;;  %v885_v8 = vsel %vm3483_vm5, %v876_v3, %v884_v63  ;;  %v1031_v10 = vshrl.u32 %v3019_v38, 16  ;;  %v1035_v11 = vshll.u32 %v3020_v7, 16  ;;  %v1263_v13 = vrot.slane %v3020_v7, 1 }
  0x41   : > { %v1030_v62 = vsel %vm4042_vm3, %v1025_v50, %v1029_v53  ;;  %v895_v9 = vsel %vm3483_vm5, %v886_v5, %v894_v6  ;;  %908 = vst.msk [vmem:[#allocation2 + $0x28] sm:$0xf] %vm4040_vm6, %v885_v8  ;;  %vm4089_vm14 = vcmask 123905   ;;  %v768_v21 = vpack.c.bf16 %v724_v19, %v724_v19  ;;  %v753_v3 = vld [vmem:[#allocation2 + $0x40] sm:$0x4] }
  0x42   : > { %909 = vst.msk [vmem:[#allocation2 + $0x2c] sm:$0xf] %vm4040_vm6, %v895_v9  ;;  %vm3508_vm0 = vmand %vm4089_vm14, %vm4039_vm1  ;;  %v1033_v17 = vor.u32 %v1031_v10, %v1029_v53  ;;  %v1037_v18 = vrot.slane %v1035_v11, 1  ;;  %v1264_v20 = vsel %vm4092_vm9, %v1261_v48, %v1263_v13  ;;  %v896_v24 = vrot.slane %v894_v6, 4 }
  0x43   : > { %v748_v16 = vsel %vm3508_vm0, 0, %v747_v15  ;;  %v769_v25 = vpack.c.bf16 %v725_v22, %v725_v22  ;;  %v922_v26 = vrot.slane %v768_v21, 6  ;;  %vm4046_vm14 = vcmask 123904  }
  0x44   : > { %749 = vst [vmem:[#allocation2 + $0x30] sm:$0x2] %v748_v16  ;;  %v1038_v23 = vsel %vm4042_vm3, %v1033_v17, %v1037_v18  ;;  %vm4044_vm1 = vcmask 1041408   ;;  %vm920_vm6 = vcmask 1045508   ;;  %vm3523_vm5 = vmand %vm4046_vm14, %vm4043_vm15  ;;  %v4093_v28 = vmov 0 }
  0x45   : > { %v923_v27 = vrot.slane %v922_v26, 4  ;;  %v4094_v28 = vsel %vm3523_vm5, 4294967295, %v4093_v28  ;;  %v924_v31 = vrot.slane %v769_v25, 6  ;;  %vm3530_vm9 = vmor %vm4044_vm1, %vm920_vm6  ;;  %vm4045_vm3 = vcmask 125954  }
  0x46   : > { %939 = vst.msk [vmem:[#allocation2 + $0x30] sm:$0xc] %vm4045_vm3, %v922_v26  ;;  %vm4097_vm15 = vcmask 125952   ;;  %vm4098_vm6 = vcmask 1046528   ;;  %v770_v46 = vpack.c.bf16 %v726_v44, %v726_v44  ;;  %vm4099_vm1 = vsmask.f32 7424 }
  0x47   : > { %v3021_v32 = vld [vmem:[#allocation2 + $0x20] sm:$0xff]  ;;  %v925_v36 = vsel %vm3530_vm9, %v923_v27, %v924_v31  ;;  %v771_v49 = vpack.c.bf16 %v727_v47, %v727_v47  ;;  %v926_v51 = vrot.slane %v924_v31, 4  ;;  %vm750_vm3 = vcmask 124930  }
  0x48   : > { %2803 = vmatmul.msk.bf16.gmra.mxu1 %vm1088_vm13, %v3018_v14  ;;  %940 = vst.msk [vmem:[#allocation2 + $0x34] sm:$0xf] %vm4097_vm15, %v925_v36  ;;  %v1043_v40 = vshll.u32 %v3021_v32, 16  ;;  %v1265_v41 = vrot.slane %v3021_v32, 1  ;;  %v927_v50 = vrot.slane %v770_v46, 6  ;;  %v1047_v58 = vshrl.u32 %v3021_v32, 16 }
  0x49   : > { %v930_v53 = vrot.slane %v771_v49, 6  ;;  %v3022_v55 = vld [vmem:[#allocation2 + $0x28] sm:$0xff]  ;;  %vm751_vm14 = vsmask.f32 2304 }
  0x4a   : > { %v1045_v43 = vrot.slane %v1043_v40, 1  ;;  %v1266_v45 = vsel %vm4098_vm6, %v1263_v13, %v1265_v41  ;;  %v929_v54 = vrot.slane %v927_v50, 4  ;;  %v928_v56 = vsel %vm3530_vm9, %v926_v51, %v927_v50  ;;  %vm4100_vm6 = vmmov %vm4097_vm15 }
  0x4b   : > { %v912_v30 = vld [vmem:[#allocation2 + $0x30] sm:$0x3]  ;;  %941 = vst.msk [vmem:[#allocation2 + $0x38] sm:$0xf] %vm4097_vm15, %v928_v56  ;;  %v1051_v59 = vshll.u32 %v3022_v55, 16  ;;  %v1267_v60 = vrot.slane %v3022_v55, 1  ;;  %vm3555_vm7 = vmand %vm750_vm3, %vm751_vm14 }
  0x4c   : > { %v913_v33 = vsel %vm3523_vm5, %v896_v24, %v912_v30  ;;  %v1049_v61 = vor.u32 %v1047_v58, %v1045_v43  ;;  %vm4102_vm5 = vsmask.f32 7424  ;;  %v932_v5 = vrot.slane %v930_v53, 4 }
  0x4d   : > { %914 = vst [vmem:[#allocation2 + $0x30] sm:$0x3] %v913_v33  ;;  %v754_v6 = vsel %vm3555_vm7, 0, %v753_v3  ;;  %vm4105_vm15 = vcmask 123904   ;;  %v1055_v8 = vshrl.u32 %v3022_v55, 16 }
  0x4e   : > { %2818 = vmatmul.msk.bf16.gmra.mxu2 %vm1088_vm13, %v1262_v57  ;;  %v931_v57 = vsel %vm3530_vm9, %v929_v54, %v930_v53  ;;  %755 = vst [vmem:[#allocation2 + $0x40] sm:$0x4] %v754_v6 }
  0x4f   : > { %2790 = vmatmul.msk.bf16.gmra.mxu0 %vm1088_vm13, %v1030_v62  ;;  %942 = vst.msk [vmem:[#allocation2 + $0x3c] sm:$0xf] %vm4100_vm6, %v931_v57  ;;  %v1053_v62 = vrot.slane %v1051_v59, 1 }
  0x50   : > { %944 = vst.msk [vmem:[#allocation2 + $0x40] sm:$0x3] %vm4105_vm15, %v932_v5 }
  0x51   : > { %v1054_v0 = vsel %vm4102_vm5, %v1049_v61, %v1053_v62  ;;  %v1057_v11 = vor.u32 %v1055_v8, %v1053_v62 }
  0x56   : > { %v3024_v17 = vld [vmem:[#allocation2 + $0x38] sm:$0xff] }
  0x57   : > { %v1067_v19 = vshll.u32 %v3024_v17, 16  ;;  %v1247_v25 = vld [vmem:[#allocation2 + $0x40] sm:$0x7]  ;;  %v1071_v33 = vshrl.u32 %v3024_v17, 16 }
  0x58   : > { %2804 = vmatmul.msk.bf16.gmra.mxu1 %vm1088_vm13, %v3019_v38  ;;  %v1039_v38 = vshrl.u32 %v3020_v7, 16  ;;  %v1254_v30 = vunpack.c.l.b16 %v1247_v25 }
  0x59   : > { %v1069_v22 = vrot.slane %v1067_v19, 1 }
  0x5a   : > { %v1041_v42 = vor.u32 %v1039_v38, %v1037_v18 }
  0x5b   : > { %v1073_v40 = vor.u32 %v1071_v33, %v1069_v22 }
  0x5c   : > { %v1046_v48 = vsel %vm4099_vm1, %v1041_v42, %v1045_v43  ;;  %vm4101_vm1 = vcmask 1046528  }
  0x5d   : > { %v1268_v63 = vsel %vm4101_vm1, %v1265_v41, %v1267_v60  ;;  %vm4106_vm3 = vmmov %vm4101_vm1 }
  0x5e   : > { %2819 = vmatmul.msk.bf16.gmra.mxu2 %vm1088_vm13, %v1264_v20  ;;  %v1271_v20 = vrot.slane %v3024_v17, 1  ;;  %vm4107_vm6 = vmmov %vm4101_vm1 }
  0x5f   : > { %2791 = vmatmul.msk.bf16.gmra.mxu0 %vm1088_vm13, %v1038_v23  ;;  %v961_v23 = vld [vmem:[#allocation2 + $0x40] sm:$0x3]  ;;  %vm4108_vm1 = vmmov %vm4102_vm5 }
  0x60   : > { %v1000_v27 = vunpack.c.l.b16 %v961_v23  ;;  %vm4109_vm15 = vmmov %vm4106_vm3 }
  0x62   : > { %v1009_v31 = vpack.c.b16 %v1000_v27, %v1000_v27 }
  0x64   : > { %v1075_v36 = vshll.u32 %v1009_v31, 16  ;;  %v1079_v8 = vshrl.u32 %v1009_v31, 16 }
  0x66   : > { %v1077_v41 = vrot.slane %v1075_v36, 1 }
  0x68   : > { %2805 = vmatmul.msk.bf16.gmra.mxu1 %vm1088_vm13, %v3020_v7  ;;  %v3023_v7 = vld [vmem:[#allocation2 + $0x30] sm:$0xff] }
  0x69   : > { %v1059_v9 = vshll.u32 %v3023_v7, 16  ;;  %v1269_v10 = vrot.slane %v3023_v7, 1  ;;  %v1063_v18 = vshrl.u32 %v3023_v7, 16 }
  0x6b   : > { %v1061_v13 = vrot.slane %v1059_v9, 1  ;;  %v1270_v15 = vsel %vm4106_vm3, %v1267_v60, %v1269_v10  ;;  %v1272_v24 = vsel %vm4107_vm6, %v1269_v10, %v1271_v20  ;;  %vm4110_vm3 = vmmov %vm4108_vm1  ;;  %v1081_v10 = vor.u32 %v1079_v8, %v1077_v41 }
  0x6c   : > { %v1078_v43 = vsel %vm4110_vm3, %v1073_v40, %v1077_v41  ;;  %vm4114_vm6 = vcmask 1041408  }
  0x6d   : > { %v1062_v16 = vsel %vm4102_vm5, %v1057_v11, %v1061_v13  ;;  %v1065_v21 = vor.u32 %v1063_v18, %v1061_v13  ;;  %vm4113_vm5 = vcmask 1040384  }
  0x6e   : > { %2820 = vmatmul.msk.bf16.gmra.mxu2 %vm1088_vm13, %v1266_v45 }
  0x6f   : > { %2792 = vmatmul.msk.bf16.gmra.mxu0 %vm1088_vm13, %v1046_v48  ;;  %v1070_v26 = vsel %vm4108_vm1, %v1065_v21, %v1069_v22  ;;  %vm1469_vm1 = vcmask 23552  }
  0x78   : > { %2806 = vmatmul.msk.bf16.gmra.mxu1 %vm1088_vm13, %v3021_v32  ;;  %v1256_v32 = vpack.c.b16 %v1254_v30, %v1254_v30 }
  0x7a   : > { %v1273_v38 = vrot.slane %v1256_v32, 1 }
  0x7c   : > { %v1274_v42 = vsel %vm4109_vm15, %v1271_v20, %v1273_v38 }
  0x7e   : > { %2821 = vmatmul.msk.bf16.gmra.mxu2 %vm1088_vm13, %v1268_v63 }
  0x7f   : > { %2793 = vmatmul.msk.bf16.gmra.mxu0 %vm1088_vm13, %v1054_v0 }
  0x88   : > { %2807 = vmatmul.msk.bf16.gmra.mxu1 %vm1088_vm13, %v3022_v55 }
  0x8e   : > { %2822 = vmatmul.msk.bf16.gmra.mxu2 %vm1088_vm13, %v1270_v15 }
  0x8f   : > { %2794 = vmatmul.msk.bf16.gmra.mxu0 %vm1088_vm13, %v1062_v16 }
  0x98   : > { %2808 = vmatmul.msk.bf16.gmra.mxu1 %vm1088_vm13, %v3023_v7 }
  0x9e   : > { %2823 = vmatmul.msk.bf16.gmra.mxu2 %vm1088_vm13, %v1272_v24 }
  0x9f   : > { %2795 = vmatmul.msk.bf16.gmra.mxu0 %vm1088_vm13, %v1070_v26 }
  0xa8   : > { %2809 = vmatmul.msk.bf16.gmra.mxu1 %vm1088_vm13, %v3024_v17 }
  0xae   : > { %2824 = vmatmul.msk.bf16.gmra.mxu2 %vm1088_vm13, %v1274_v42 }
  0xaf   : > { %2796 = vmatmul.msk.bf16.gmra.mxu0 %vm1088_vm13, %v1078_v43 }
  0xb5   : > { %v1202_v44 = vpop.f32.mrf.mxu1 }
  0xb8   : > { %2810 = vmatmul.msk.bf16.gmra.mxu1 %vm1088_vm13, %v1009_v31 }
  0xbc   : > { %v1125_v45 = vpop.f32.mrf.mxu0 }
  0xbd   : > { %v3580_v46 = vpop.f32.mrf.mxu1  ;;  %v1203_v47 = vadd.f32 %v1202_v44, %v1125_v45 }
  0xbe   : > { %2825 = vmatmul.msk.bf16.gmra.mxu2 %vm1088_vm13, %v1273_v38 }
  0xbf   : > { %2797 = vmatmul.msk.bf16.gmra.mxu0 %vm1088_vm13, %v1081_v10 }
  0xc1   : > { %v1317_v48 = vpop.f32.mrf.mxu2 }
  0xc2   : > { %v3583_v49 = vadd.f32 %v1317_v48, %v1203_v47 }
  0xc4   : > { %v3585_v50 = vpop.f32.mrf.mxu0 }
  0xc5   : > { %v1207_v51 = vpop.f32.mrf.mxu1 }
  0xc9   : > { %v3587_v53 = vpop.f32.mrf.mxu2 }
  0xcc   : > { %v1130_v54 = vpop.f32.mrf.mxu0 }
  0xcd   : > { %v3589_v55 = vpop.f32.mrf.mxu1  ;;  %v1208_v56 = vadd.f32 %v1207_v51, %v1130_v54 }
  0xd1   : > { %v1322_v57 = vpop.f32.mrf.mxu2 }
  0xd2   : > { %v3591_v58 = vadd.f32 %v1322_v57, %v1208_v56 }
  0xd4   : > { %v3593_v59 = vpop.f32.mrf.mxu0 }
  0xd5   : > { %v1212_v60 = vpop.f32.mrf.mxu1 }
  0xd9   : > { %v3595_v61 = vpop.f32.mrf.mxu2 }
  0xdc   : > { %v1135_v62 = vpop.f32.mrf.mxu0 }
  0xdd   : > { %v3597_v63 = vpop.f32.mrf.mxu1  ;;  %v1213_v0 = vadd.f32 %v1212_v60, %v1135_v62 }
  0xe1   : > { %v1327_v3 = vpop.f32.mrf.mxu2 }
  0xe2   : > { %v3599_v5 = vadd.f32 %v1327_v3, %v1213_v0  ;;  %v3611_v3 = vld [vmem:[%s4111_s26] ss:$0 sm:$0xff]  ;;  %s702_s26 = sand.u32 1, %s3202_s30  }
  0xe3   : > { %s2752_s2 = sshll.u32 %s702_s26, 3 }
  0xe4   : > { %v3601_v6 = vpop.f32.mrf.mxu0  ;;  %s704_s24 = scalar_lea.vmem [#allocation6], %s2752_s2  ;;  %s3168_s2 = scalar_lea.hbm %s4023_s23, 16 }
  0xe5   : > { %v1217_v7 = vpop.f32.mrf.mxu1  ;;  %s2686_s25 = sshll.u32 %s704_s24, 4  ;;  %s2687_s25 = int_to_ptr.vmem [resolvable:$true] %s2686_s25 }
  0xe9   : > { %v3603_v9 = vpop.f32.mrf.mxu2 }
  0xec   : > { %v1140_v11 = vpop.f32.mrf.mxu0 }
  0xed   : > { %v1219_v13 = vpop.f32.mrf.mxu1  ;;  %v1218_v15 = vadd.f32 %v1217_v7, %v1140_v11 }
  0xf1   : > { %v1332_v16 = vpop.f32.mrf.mxu2 }
  0xf2   : > { %v3606_v17 = vadd.f32 %v1332_v16, %v1218_v15 }
  0xf4   : > { %v1142_v18 = vpop.f32.mrf.mxu0 }
  0xf5   : > { %v1222_v19 = vpop.f32.mrf.mxu1 }
  0xf9   : > { %v1334_v20 = vpop.f32.mrf.mxu2 }
  0xfc   : > { %v1145_v21 = vpop.f32.mrf.mxu0 }
  0xfd   : > { %v1224_v22 = vpop.f32.mrf.mxu1  ;;  %v1223_v23 = vadd.f32 %v1222_v19, %v1145_v21 }
 0x101   : > { %v1337_v24 = vpop.f32.mrf.mxu2 }
 0x102   : > { %v1369_v25 = vadd.f32 %v1337_v24, %v1223_v23 }
 0x104   : > { %v1147_v26 = vpop.f32.mrf.mxu0 }
 0x105   : > { %v1227_v27 = vpop.f32.mrf.mxu1 }
 0x109   : > { %v1339_v30 = vpop.f32.mrf.mxu2 }
 0x10c   : > { %v1150_v31 = vpop.f32.mrf.mxu0 }
 0x10d   : > { %v1229_v32 = vpop.f32.mrf.mxu1  ;;  %v1228_v10 = vadd.f32 %v1227_v27, %v1150_v31 }
 0x111   : > { %v1342_v33 = vpop.f32.mrf.mxu2 }
 0x114   : > { %v1152_v36 = vpop.f32.mrf.mxu0 }
 0x115   : > { %v1232_v38 = vpop.f32.mrf.mxu1  ;;  %v1230_v15 = vadd.f32 %v1229_v32, %v1152_v36  ;;  %v1220_v36 = vadd.f32 %v1219_v13, %v1142_v18 }
 0x119   : > { %v1344_v40 = vpop.f32.mrf.mxu2 }
 0x11a   : > { %v1372_v23 = vadd.f32 %v1344_v40, %v1230_v15  ;;  %v1368_v40 = vadd.f32 %v1334_v20, %v1220_v36  ;;  %v1210_v20 = vadd.f32 %v3589_v55, %v3593_v59 }
 0x11c   : > { %v1155_v41 = vpop.f32.mrf.mxu0  ;;  %v1393_v27 = vadd.f32 %v3611_v3, %v1372_v23  ;;  %v1389_v13 = vadd.f32 %v3611_v3, %v1368_v40 }
 0x11d   : > { %v1234_v43 = vpop.f32.mrf.mxu1  ;;  %v1233_v57 = vadd.f32 %v1232_v38, %v1155_v41  ;;  %v1225_v41 = vadd.f32 %v1224_v22, %v1147_v26  ;;  %v1215_v26 = vadd.f32 %v3597_v63, %v3601_v6  ;;  %v1364_v63 = vadd.f32 %v3595_v61, %v1210_v20  ;;  %v3028_v20 = vld [vmem:[%s4112_s1 + $0x4] sm:$0xf] }
 0x11e   : > { %v1410_v22 = vmax.f32 %v1393_v27, 0.0  ;;  %v1384_v61 = vadd.f32 %v3611_v3, %v3591_v58  ;;  %v3029_v58 = vld [vmem:[%s4112_s1 + $0x4] sm:$0xf0] }
 0x11f   : > { %v1385_v59 = vadd.f32 %v3611_v3, %v1364_v63  ;;  %v3030_v63 = vld [vmem:[%s4112_s1 + $0x14] sm:$0xf] }
 0x121   : > { %v1347_v42 = vpop.f32.mrf.mxu2 }
 0x122   : > { %v1373_v16 = vadd.f32 %v1347_v42, %v1233_v57  ;;  %v1366_v57 = vadd.f32 %v3603_v9, %v1215_v26  ;;  %v1205_v9 = vadd.f32 %v3580_v46, %v3585_v50  ;;  %v1402_v46 = vmax.f32 %v1385_v59, 0.0 }
 0x123   : > { %v1382_v50 = vadd.f32 %v3611_v3, %v3583_v49 }
 0x124   : > { %v1157_v44 = vpop.f32.mrf.mxu0  ;;  %v1387_v6 = vadd.f32 %v3611_v3, %v1366_v57  ;;  %v1362_v55 = vadd.f32 %v3587_v53, %v1205_v9  ;;  %v2846_v9 = vld [vmem:[%s4112_s1 + $0x28] sm:$0xf0] }
 0x125   : > { %v1237_v47 = vpop.f32.mrf.mxu1  ;;  %v1235_v60 = vadd.f32 %v1234_v43, %v1157_v44  ;;  %v1371_v43 = vadd.f32 %v1342_v33, %v1228_v10  ;;  %v1394_v44 = vadd.f32 %v3611_v3, %v1373_v16  ;;  %v1390_v33 = vadd.f32 %v3611_v3, %v1369_v25 }
 0x126   : > { %v1383_v16 = vadd.f32 %v3611_v3, %v1362_v55  ;;  %v1399_v23 = vmax.f32 %v1382_v50, 0.0  ;;  %v2854_v55 = vld [vmem:[%s4112_s1 + $0x38] sm:$0xf0] }
 0x127   : > { %v1392_v42 = vadd.f32 %v3611_v3, %v1371_v43 }
 0x128   : > { %v1400_v53 = vmax.f32 %v1383_v16, 0.0 }
 0x129   : > { %v1349_v45 = vpop.f32.mrf.mxu2 }
 0x12a   : > { %v1374_v7 = vadd.f32 %v1349_v45, %v1235_v60  ;;  %v1370_v45 = vadd.f32 %v1339_v30, %v1225_v41  ;;  %v1409_v30 = vmax.f32 %v1392_v42, 0.0 }
 0x12c   : > { %v1160_v48 = vpop.f32.mrf.mxu0  ;;  %v1395_v24 = vadd.f32 %v3611_v3, %v1374_v7  ;;  %v1429_v18 = vpack.c.bf16 %v1410_v22, %v1409_v30  ;;  %v1406_v7 = vmax.f32 %v1389_v13, 0.0  ;;  %v2844_v30 = vld [vmem:[%s4112_s1 + $0x20] sm:$0xf]  ;;  %v2852_v13 = vld [vmem:[%s4112_s1 + $0x30] sm:$0xf] }
 0x12d   : > { %v1238_v54 = vadd.f32 %v1237_v47, %v1160_v48  ;;  %v1239_v0 = vpop.f32.mrf.mxu1 }
 0x12e   : > { %v1412_v31 = vmax.f32 %v1395_v24, 0.0  ;;  %v2828_v24 = vld [vmem:[%s4112_s1] sm:$0xf] }
 0x12f   : > { %v2829_v41 = vor.u32 %v3029_v58, %v2828_v24 }
 0x131   : > { %v1352_v51 = vpop.f32.mrf.mxu2 }
 0x132   : > { %v1375_v62 = vadd.f32 %v1352_v51, %v1238_v54  ;;  %v1411_v51 = vmax.f32 %v1394_v44, 0.0  ;;  %v1391_v54 = vadd.f32 %v3611_v3, %v1370_v45  ;;  %v3031_v45 = vld [vmem:[%s4112_s1 + $0x14] sm:$0xf0] }
 0x134   : > { %v1162_v56 = vpop.f32.mrf.mxu0  ;;  %v1396_v21 = vadd.f32 %v3611_v3, %v1375_v62  ;;  %v1408_v60 = vmax.f32 %v1391_v54, 0.0  ;;  %v1388_v62 = vadd.f32 %v3611_v3, %v3606_v17 }
 0x135   : > { %v1240_v8 = vadd.f32 %v1239_v0, %v1162_v56  ;;  %v1430_v56 = vpack.c.bf16 %v1412_v31, %v1411_v51  ;;  %v1407_v0 = vmax.f32 %v1390_v33, 0.0  ;;  %v1242_v43 = vpop.f32.mrf.mxu1 }
 0x136   : > { %v1413_v47 = vmax.f32 %v1396_v21, 0.0  ;;  %v1405_v10 = vmax.f32 %v1388_v62, 0.0  ;;  %v2830_v62 = vld [vmem:[%s4112_s1 + $0x8] sm:$0xf0] }
 0x137   : > { %v1428_v25 = vpack.c.bf16 %v1408_v60, %v1407_v0  ;;  %v2833_v0 = vor.u32 %v3028_v20, %v2830_v62 }
 0x138   : > { %v1427_v17 = vpack.c.bf16 %v1406_v7, %v1405_v10  ;;  %v3032_v7 = vld [vmem:[%s4112_s1 + $0x24] sm:$0xf]  ;;  %v3034_v10 = vld [vmem:[%s4112_s1 + $0x34] sm:$0xf] }
 0x139   : > { %v1354_v11 = vpop.f32.mrf.mxu2  ;;  %v2857_v59 = vor.u32 %v3034_v10, %v2854_v55 }
 0x13a   : > { %v1376_v19 = vadd.f32 %v1354_v11, %v1240_v8  ;;  %v1386_v8 = vadd.f32 %v3611_v3, %v3599_v5  ;;  %v1404_v11 = vmax.f32 %v1387_v6, 0.0  ;;  %v1401_v5 = vmax.f32 %v1384_v61, 0.0  ;;  %v2838_v6 = vld [vmem:[%s4112_s1 + $0x18] sm:$0xf0]  ;;  %v3040_v61 = vld [vmem:[%s4115_s3 + $0x8] sm:$0xff] }
 0x13b   : > { %1780 = vmatpush.bf16.msrb.mxu0 %v3040_v61 }
 0x13c   : > { %v1397_v38 = vadd.f32 %v3611_v3, %v1376_v19  ;;  %v1403_v15 = vmax.f32 %v1386_v8, 0.0  ;;  %v1425_v21 = vpack.c.bf16 %v1402_v46, %v1401_v5  ;;  %v1165_v44 = vpop.f32.mrf.mxu0  ;;  %v2849_v8 = vor.u32 %v3032_v7, %v2846_v9  ;;  %v1571_v5 = vld [vmem:[#allocation3] sm:$0x1] }
 0x13d   : > { %v1243_v27 = vadd.f32 %v1242_v43, %v1165_v44  ;;  %v3725_v44 = vld [vmem:[%s4117_s6] ss:$0 sm:$0xff]  ;;  %s3015_s6 = sshll.u32 %s3354_s5, 3 }
 0x13e   : > { %v1414_v48 = vmax.f32 %v1397_v38, 0.0  ;;  %v1426_v19 = vpack.c.bf16 %v1404_v11, %v1403_v15  ;;  %v1424_v38 = vpack.c.bf16 %v1400_v53, %v1399_v23  ;;  %v3041_v11 = vld [vmem:[%s4115_s3 + $0x10] sm:$0xff]  ;;  %v3039_v15 = vld [vmem:[%s4115_s3] sm:$0xff]  ;;  %v1574_v23 = vld [vmem:[#allocation3 + $0x8] sm:$0x1] }
 0x13f   : > { %1903 = vmatpush.bf16.msrb.mxu2 %v3041_v11  ;;  %1829 = vmatpush.bf16.msrb.mxu1 %v3039_v15  ;;  %v1575_v24 = vsel %vm3395_vm4, 0, %v1574_v23  ;;  %vm4118_vm4 = vcmask 125952  }
 0x140   : > { %v1431_v32 = vpack.c.bf16 %v1414_v48, %v1413_v47  ;;  %v1244_v47 = vpop.f32.mrf.mxu1  ;;  %v2836_v48 = vld [vmem:[%s4112_s1 + $0x10] sm:$0xf]  ;;  %1576 = vst [vmem:[#allocation3 + $0x8] sm:$0x1] %v1575_v24 }
 0x141   : > { %v1357_v49 = vpop.f32.mrf.mxu2  ;;  %v2837_v36 = vor.u32 %v3031_v45, %v2836_v48  ;;  %v1577_v48 = vld [vmem:[#allocation3 + $0x10] sm:$0x2] }
 0x142   : > { %1489 = vmatpush.bf16.msra.mxu3 %v1431_v32  ;;  %v1377_v32 = vadd.f32 %v1357_v49, %v1243_v27  ;;  %v1578_v45 = vsel %vm3466_vm8, 0, %v1577_v48  ;;  %vm4125_vm8 = vnez %v4087_v39 }
 0x143   : > { %1579 = vst [vmem:[#allocation3 + $0x10] sm:$0x2] %v1578_v45 }
 0x144   : > { %v1398_v42 = vadd.f32 %v3611_v3, %v1377_v32  ;;  %v1167_v40 = vpop.f32.mrf.mxu0  ;;  %v3033_v3 = vld [vmem:[%s4112_s1 + $0x24] sm:$0xf0] }
 0x145   : > { %v2845_v57 = vor.u32 %v3033_v3, %v2844_v30  ;;  %v1580_v3 = vld [vmem:[#allocation3 + $0x18] sm:$0x2] }
 0x146   : > { %1490 = vmatpush.bf16.msra.mxu3 %v1430_v56  ;;  %v1415_v51 = vmax.f32 %v1398_v42, 0.0  ;;  %v3212_v56 = vmov 65535  }
 0x147   : > { %v1484_v22 = vsel %vm4113_vm5, 4294967295, %v3212_v56  ;;  %vm4128_vm5 = vcmask 125954  }
 0x148   : > { %v1432_v54 = vpack.c.bf16 %v1415_v51, %v1415_v51  ;;  %v3657_v26 = vsel %vm4114_vm6, %v1484_v22, 0 }
 0x149   : > { %v1359_v31 = vpop.f32.mrf.mxu2 }
 0x14a   : > { %1491 = vmatpush.bf16.msra.mxu3 %v1429_v18  ;;  %v1487_v33 = vand.u32 %v3657_v26, %v1432_v54  ;;  %v3035_v18 = vld [vmem:[%s4112_s1 + $0x34] sm:$0xf0] }
 0x14b   : > { %v2853_v60 = vor.u32 %v3035_v18, %v2852_v13  ;;  %v1581_v18 = vsel %vm3508_vm0, 0, %v1580_v3  ;;  %vm4119_vm0 = vcmask 125953  }
 0x14c   : > { %1582 = vst [vmem:[#allocation3 + $0x18] sm:$0x2] %v1581_v18 }
 0x14e   : > { %1492 = vmatpush.bf16.msra.mxu3 %v1428_v25  ;;  %v2841_v25 = vor.u32 %v3030_v63, %v2838_v6 }
 0x152   : > { %1493 = vmatpush.bf16.msra.mxu3 %v1427_v17 }
 0x156   : > { %1494 = vmatpush.bf16.msra.mxu3 %v1426_v19 }
 0x15a   : > { %1495 = vmatpush.bf16.msra.mxu3 %v1425_v21  ;;  %v1572_v21 = vsel %vm3387_vm2, 0, %v1571_v5 }
 0x15b   : > { %1573 = vst [vmem:[#allocation3] sm:$0x1] %v1572_v21  ;;  %v1583_v21 = vld [vmem:[#allocation3 + $0x20] sm:$0x4] }
 0x15e   : > { %1496 = vmatpush.bf16.msra.mxu3 %v1424_v38 }
 0x161   : > { %1497 = vmatmul.bf16.vlgmr.msra.gmra.mxu3 %v2829_v41  ;;  %v3720_v41 = vld [vmem:[%s4116_s27] ss:$0 sm:$0xff]  ;;  %s2674_s27 = scalar_lea.sflag [#allocation7], %s702_s26 }
 0x162   : > { %1525 = vmatpush.bf16.msrb.mxu3 %v1487_v33  ;;  %v1614_v54 = vld [vmem:[#allocation3] sm:$0xf] }
 0x171   : > { %1502 = vmatmul.bf16.gmra.mxu3 %v2837_v36 }
 0x181   : > { %1507 = vmatmul.bf16.gmra.mxu3 %v2845_v57 }
 0x191   : > { %1512 = vmatmul.bf16.gmra.mxu3 %v2853_v60 }
 0x1a1   : > { %2858 = vmatmul.msk.bf16.vlgmr.msrb.gmra.mxu3 %vm1469_vm1, %v2833_v0  ;;  %v1618_v0 = vld [vmem:[#allocation3 + $0x8] sm:$0x1] }
 0x1b1   : > { %2859 = vmatmul.msk.bf16.gmra.mxu3 %vm1469_vm1, %v2841_v25 }
 0x1c1   : > { %2860 = vmatmul.msk.bf16.gmra.mxu3 %vm1469_vm1, %v2849_v8 }
 0x1d1   : > { %2861 = vmatmul.msk.bf16.gmra.mxu3 %vm1469_vm1, %v2857_v59 }
 0x1e4   : > { %v1498_v17 = vpop.f32.mrf.mxu3 }
 0x1ec   : > { %v1500_v16 = vpop.f32.mrf.mxu3 }
 0x1f4   : > { %v1503_v19 = vpop.f32.mrf.mxu3 }
 0x1fc   : > { %v1505_v46 = vpop.f32.mrf.mxu3 }
 0x204   : > { %v3705_v50 = vpop.f32.mrf.mxu3 }
 0x20c   : > { %v3709_v53 = vpop.f32.mrf.mxu3 }
 0x214   : > { %v3713_v58 = vpop.f32.mrf.mxu3 }
 0x21c   : > { %v3715_v38 = vpop.f32.mrf.mxu3 }
 0x224   : > { %v1527_v43 = vpop.f32.mrf.mxu3 }
 0x225   : > { %v1528_v49 = vadd.f32 %v1527_v43, %v1498_v17  ;;  %v1584_v43 = vsel %vm3555_vm7, 0, %v1583_v21  ;;  %vm4122_vm7 = vnez %v4085_v35 }
 0x226   : > { %1585 = vst [vmem:[#allocation3 + $0x20] sm:$0x4] %v1584_v43 }
 0x227   : > { %v1551_v4 = vmul.f32 %v3720_v41, %v1528_v49 }
 0x229   : > { %v1563_v47 = vadd.f32 %v3725_v44, %v1551_v4 }
 0x22b   : > { %v1586_v27 = vpack.c.bf16 %v1563_v47, %v1563_v47 }
 0x22c   : > { %v1529_v31 = vpop.f32.mrf.mxu3 }
 0x22d   : > { %v1595_v32 = vshrl.u32 %v1586_v27, 16  ;;  %v1530_v36 = vadd.f32 %v1529_v31, %v1500_v16  ;;  %v1598_v51 = vshll.u32 %v1586_v27, 16 }
 0x22f   : > { %v1597_v42 = vrot.slane %v1595_v32, 7  ;;  %v1552_v40 = vmul.f32 %v3720_v41, %v1530_v36 }
 0x231   : > { %v1600_v56 = vor.u32 %v1598_v51, %v1597_v42  ;;  %v1564_v22 = vadd.f32 %v3725_v44, %v1552_v40  ;;  %v1601_v63 = vrot.slane %v1597_v42, 4  ;;  %v1656_v51 = vld [vmem:[#allocation3 + $0x10] sm:$0xe] }
 0x233   : > { %v1615_v33 = vsel %vm3427_vm11, %v1600_v56, %v1614_v54  ;;  %v1587_v30 = vpack.c.bf16 %v1564_v22, %v1564_v22  ;;  %vm4123_vm11 = vmmov %vm4109_vm15 }
 0x234   : > { %1616 = vst [vmem:[#allocation3] sm:$0xf] %v1615_v33  ;;  %v1532_v12 = vpop.f32.mrf.mxu3  ;;  %vm4129_vm6 = vmmov %vm4123_vm11 }
 0x235   : > { %v1603_v57 = vshrl.u32 %v1587_v30, 16  ;;  %v1533_v13 = vadd.f32 %v1532_v12, %v1503_v19  ;;  %v1606_v20 = vshll.u32 %v1587_v30, 16 }
 0x237   : > { %v1605_v60 = vrot.slane %v1603_v57, 7  ;;  %v1553_v62 = vmul.f32 %v3720_v41, %v1533_v13 }
 0x239   : > { %v1608_v6 = vor.u32 %v1606_v20, %v1605_v60  ;;  %v1610_v25 = vrot.slane %v1605_v60, 4  ;;  %v1565_v37 = vadd.f32 %v3725_v44, %v1553_v62 }
 0x23b   : > { %v1609_v7 = vsel %vm3420_vm10, %v1601_v63, %v1608_v6  ;;  %v1619_v9 = vsel %vm3387_vm2, %v1610_v25, %v1618_v0  ;;  %v1588_v8 = vpack.c.bf16 %v1565_v37, %v1565_v37  ;;  %vm4120_vm2 = vmmov %vm4118_vm4  ;;  %vm4121_vm10 = vcmask 122880  }
 0x23c   : > { %1617 = vst.msk [vmem:[#allocation3 + $0x4] sm:$0xf] %vm4118_vm4, %v1609_v7  ;;  %v1534_v14 = vpop.f32.mrf.mxu3  ;;  %vm4126_vm15 = vmmov %vm4120_vm2  ;;  %vm4131_vm4 = vcmask 123904  }
 0x23d   : > { %1620 = vst [vmem:[#allocation3 + $0x8] sm:$0x1] %v1619_v9  ;;  %v1623_v10 = vrot.slane %v1588_v8, 7  ;;  %v1535_v55 = vadd.f32 %v1534_v14, %v1505_v46  ;;  %v1660_v9 = vld [vmem:[#allocation3 + $0x18] sm:$0x3]  ;;  %vm4130_vm1 = vmmov %vm4120_vm2 }
 0x23f   : > { %1631 = vst.msk [vmem:[#allocation3 + $0x8] sm:$0xe] %vm4119_vm0, %v1623_v10  ;;  %v1554_v59 = vmul.f32 %v3720_v41, %v1535_v55  ;;  %v1624_v1 = vrot.slane %v1623_v10, 4 }
 0x241   : > { %v1566_v17 = vadd.f32 %v3725_v44, %v1554_v59 }
 0x243   : > { %v1589_v11 = vpack.c.bf16 %v1566_v17, %v1566_v17  ;;  %v3065_v61 = vld [vmem:[#allocation3] sm:$0xff]  }
 0x244   : > { %v1537_v29 = vpop.f32.mrf.mxu3  ;;  %2889 = vmatmul.msk.bf16.vlgmr.msrb.gmra.mxu1 %vm1088_vm13, %v3065_v61  ;;  %v3079_v24 = vld [vmem:[#allocation3] sm:$0xf0]  ;;  %v1716_v4 = vshll.u32 %v3065_v61, 16  ;;  %v1714_v30 = vshrl.u32 %v3065_v61, 16 }
 0x245   : > { %v1625_v15 = vrot.slane %v1589_v11, 7  ;;  %v1538_v16 = vadd.f32 %v1537_v29, %v3705_v50  ;;  %v3080_v50 = vld [vmem:[#allocation3] sm:$0xe] }
 0x246   : > { %v3081_v47 = vor.u32 %v3080_v50, %v3079_v24  ;;  %v1718_v40 = vrot.slane %v1716_v4, 1 }
 0x247   : > { %v1626_v19 = vsel %vm3439_vm12, %v1624_v1, %v1625_v15  ;;  %v1627_v5 = vrot.slane %v1625_v15, 4  ;;  %v1555_v46 = vmul.f32 %v3720_v41, %v1538_v16  ;;  %vm4124_vm12 = vmmov %vm4110_vm3  ;;  %vm4127_vm3 = vnez %v4094_v28 }
 0x248   : > { %1632 = vst.msk [vmem:[#allocation3 + $0xc] sm:$0xf] %vm4120_vm2, %v1626_v19  ;;  %v1866_v54 = vrot.slane %v3081_v47, 1  ;;  %v1719_v57 = vor.u32 %v1718_v40, %v1714_v30  ;;  %vm4132_vm0 = vmmov %vm4124_vm12 }
 0x249   : > { %1633 = vst.msk [vmem:[#allocation3 + $0x10] sm:$0x1] %vm4121_vm10, %v1627_v5  ;;  %v1567_v23 = vadd.f32 %v3725_v44, %v1555_v46  ;;  %vm4134_vm2 = vmmov %vm4132_vm0 }
 0x24a   : > { %vm4135_vm10 = vmmov %vm4129_vm6 }
 0x24b   : > { %v1590_v49 = vpack.c.bf16 %v1567_v23, %v1567_v23 }
 0x24c   : > { %v1539_v52 = vpop.f32.mrf.mxu3 }
 0x24d   : > { %v1635_v48 = vshrl.u32 %v1590_v49, 16  ;;  %v1638_v45 = vshll.u32 %v1590_v49, 16  ;;  %v1540_v27 = vadd.f32 %v1539_v52, %v3709_v53 }
 0x24f   : > { %v1637_v31 = vrot.slane %v1635_v48, 6  ;;  %v1640_v32 = vrot.slane %v1638_v45, 7  ;;  %v1556_v36 = vmul.f32 %v3720_v41, %v1540_v27  ;;  %v3036_v42 = vld [vmem:[#allocation3 + $0x8] sm:$0xff] }
 0x250   : > { %v1867_v22 = vrot.slane %v3036_v42, 1  ;;  %v1721_v33 = vshll.u32 %v3036_v42, 16  ;;  %v1725_v1 = vshrl.u32 %v3036_v42, 16 }
 0x251   : > { %v1641_v2 = vor.u32 %v1640_v32, %v1637_v31  ;;  %v1568_v56 = vadd.f32 %v3725_v44, %v1556_v36 }
 0x252   : > { %v1868_v53 = vsel %vm4123_vm11, %v1866_v54, %v1867_v22  ;;  %v1723_v18 = vrot.slane %v1721_v33, 1  ;;  %vm1979_vm11 = vcmask 547840  }
 0x253   : > { %v1657_v12 = vsel %vm4122_vm7, %v1641_v2, %v1656_v51  ;;  %v1591_v3 = vpack.c.bf16 %v1568_v56, %v1568_v56  ;;  %2900 = vmatmul.msk.bf16.vlgmr.msrb.gmra.mxu2 %vm1088_vm13, %v1868_v53  ;;  %v1642_v25 = vrot.slane %v1641_v2, 4  ;;  %vm4136_vm7 = vmmov %vm4132_vm0 }
 0x254   : > { %1658 = vst [vmem:[#allocation3 + $0x10] sm:$0xe] %v1657_v12  ;;  %v1542_v13 = vpop.f32.mrf.mxu3  ;;  %2890 = vmatmul.msk.bf16.gmra.mxu1 %vm1088_vm13, %v3036_v42  ;;  %v1724_v0 = vsel %vm4124_vm12, %v1719_v57, %v1723_v18  ;;  %v1727_v5 = vor.u32 %v1725_v1, %v1723_v18  ;;  %vm2024_vm12 = vcmask 253952  }
 0x255   : > { %v1644_v60 = vshrl.u32 %v1591_v3, 16  ;;  %v1647_v20 = vshll.u32 %v1591_v3, 16  ;;  %v1543_v62 = vadd.f32 %v1542_v13, %v3713_v58  ;;  %2880 = vmatmul.msk.bf16.vlgmr.msrb.gmra.mxu0 %vm1088_vm13, %v1724_v0 }
 0x257   : > { %v1646_v63 = vrot.slane %v1644_v60, 6  ;;  %v1649_v35 = vrot.slane %v1647_v20, 7  ;;  %v1557_v6 = vmul.f32 %v3720_v41, %v1543_v62  ;;  %v3136_v20 = vld [vmem:[%s4137_s4] ss:$0 sm:$0xff]  ;;  %s2684_s4 = scalar_lea.hbm %s4023_s23, %s3015_s6 }
 0x258   : > { %s2688_s1 = sshll.u32 %s2684_s4, 4  ;;  %s2689_s1 = int_to_ptr.hbm [resolvable:$true] %s2688_s1 }
 0x259   : > { %v1650_v37 = vor.u32 %v1649_v35, %v1646_v63  ;;  %v1569_v7 = vadd.f32 %v3725_v44, %v1557_v6  ;;  %s3162_s28 = sshra.s32 %s2689_s1, 4  ;;  %s3163_s28 = int_to_ptr.hbm [resolvable:$true] %s3162_s28 }
 0x25a   : > { %s3164_s5 = scalar_lea.hbm %s3163_s28, 8  ;;  %p3169_p0 = scmp.lt.s32.totalorder %s3163_s28, %s4023_s23 }
 0x25b   : > { %v1651_v8 = vsel %vm4125_vm8, %v1642_v25, %v1650_v37  ;;  %v1652_v14 = vrot.slane %v1650_v37, 4  ;;  %v1592_v10 = vpack.c.bf16 %v1569_v7, %v1569_v7  ;;  %vm4138_vm8 = vsmask.f32 256  ;;  %p3165_p11 = scmp.ne.s32.totalorder %s3163_s28, %s3164_s5  ;;  %p3170_p1 = scmp.lt.s32.totalorder %s3168_s2, %s3164_s5 }
 0x25c   : > { %1659 = vst.msk [vmem:[#allocation3 + $0x14] sm:$0xf] %vm4126_vm15, %v1651_v8  ;;  %v1544_v58 = vpop.f32.mrf.mxu3  ;;  %vm3816_vm15 = vmand %vm2024_vm12, %vm4138_vm8 }
 0x25d   : > { %v1661_v55 = vsel %vm4127_vm3, %v1652_v14, %v1660_v9  ;;  %v1665_v59 = vrot.slane %v1592_v10, 6  ;;  %v1545_v17 = vadd.f32 %v1544_v58, %v3715_v38  ;;  %vm4141_vm3 = vsmask.f32 7938  ;;  %p3166_p12 = pnand %p3165_p11, %p3371_p5  ;;  %p3171_p2 = por %p3170_p1, %p3169_p0 }
 0x25e   : > { %1662 = vst [vmem:[#allocation3 + $0x18] sm:$0x3] %v1661_v55  ;;  %vm4149_vm8 = vmmov %vm4141_vm3 }
 0x25f   : > { %1673 = vst.msk [vmem:[#allocation3 + $0x18] sm:$0xc] %vm4128_vm5, %v1665_v59  ;;  %v1558_v11 = vmul.f32 %v3720_v41, %v1545_v17  ;;  %v1666_v15 = vrot.slane %v1665_v59, 4  ;;  %vm2029_vm5 = vmand %vm2024_vm12, %vm4141_vm3  ;;  %p3167_p13 = pneg %p3166_p12 }
 0x261   : > { %v1570_v61 = vadd.f32 %v3725_v44, %v1558_v11  ;;  %p3172_p3 = pnand %p3171_p2, %p3167_p13 }
 0x263   : > { %v1593_v39 = vpack.c.bf16 %v1570_v61, %v1570_v61  ;;  %v3037_v29 = vld [vmem:[#allocation3 + $0x10] sm:$0xff] }
 0x264   : > { %2891 = vmatmul.msk.bf16.gmra.mxu1 %vm1088_vm13, %v3037_v29  ;;  %v1869_v19 = vrot.slane %v3037_v29, 1  ;;  %v1729_v28 = vshll.u32 %v3037_v29, 16  ;;  %v1733_v34 = vshrl.u32 %v3037_v29, 16 }
 0x265   : > { %v1667_v16 = vrot.slane %v1593_v39, 6 }
 0x266   : > { %v1870_v21 = vsel %vm4129_vm6, %v1867_v22, %v1869_v19  ;;  %v1731_v23 = vrot.slane %v1729_v28, 1 }
 0x267   : > { %v1668_v38 = vsel %vm3530_vm9, %v1666_v15, %v1667_v16  ;;  %v1669_v46 = vrot.slane %v1667_v16, 4  ;;  %2901 = vmatmul.msk.bf16.gmra.mxu2 %vm1088_vm13, %v1870_v21  ;;  %vm4133_vm9 = vmmov %vm4129_vm6  ;;  %vm2033_vm6 = vcmask 254977  }
 0x268   : > { %1674 = vst.msk [vmem:[#allocation3 + $0x1c] sm:$0xf] %vm4130_vm1, %v1668_v38  ;;  %v1732_v41 = vsel %vm4132_vm0, %v1727_v5, %v1731_v23  ;;  %v1735_v52 = vor.u32 %v1733_v34, %v1731_v23  ;;  %vm4142_vm1 = vsmask.f32 1280  ;;  %vm4145_vm0 = vsmask.f32 7942 }
 0x269   : > { %1675 = vst.msk [vmem:[#allocation3 + $0x20] sm:$0x3] %vm4131_vm4, %v1669_v46  ;;  %2881 = vmatmul.msk.bf16.gmra.mxu0 %vm1088_vm13, %v1732_v41  ;;  %vm3825_vm4 = vmand %vm2033_vm6, %vm4142_vm1 }
 0x26f   : > { %v3038_v44 = vld [vmem:[#allocation3 + $0x18] sm:$0xff] }
 0x270   : > { %v1737_v24 = vshll.u32 %v3038_v44, 16  ;;  %v1871_v43 = vrot.slane %v3038_v44, 1  ;;  %v1684_v50 = vld [vmem:[#allocation3 + $0x20] sm:$0x3]  ;;  %v1741_v51 = vshrl.u32 %v3038_v44, 16 }
 0x271   : > { %v1856_v47 = vld [vmem:[#allocation3 + $0x20] sm:$0x7]  ;;  %v1707_v45 = vunpack.c.l.b16 %v1684_v50 }
 0x272   : > { %v1739_v49 = vrot.slane %v1737_v24, 1  ;;  %v1872_v4 = vsel %vm4133_vm9, %v1869_v19, %v1871_v43  ;;  %v1863_v27 = vunpack.c.l.b16 %v1856_v47  ;;  %vm2038_vm9 = vmand %vm2033_vm6, %vm4145_vm0 }
 0x273   : > { %v1712_v31 = vpack.c.b16 %v1707_v45, %v1707_v45 }
 0x274   : > { %2892 = vmatmul.msk.bf16.gmra.mxu1 %vm1088_vm13, %v3038_v44  ;;  %v1740_v48 = vsel %vm4134_vm2, %v1735_v52, %v1739_v49  ;;  %v1865_v32 = vpack.c.b16 %v1863_v27, %v1863_v27  ;;  %v1743_v2 = vor.u32 %v1741_v51, %v1739_v49  ;;  %vm2042_vm2 = vcmask 256002  }
 0x275   : > { %v1745_v36 = vshll.u32 %v1712_v31, 16  ;;  %v1749_v22 = vshrl.u32 %v1712_v31, 16 }
 0x276   : > { %v1873_v42 = vrot.slane %v1865_v32, 1 }
 0x277   : > { %2902 = vmatmul.msk.bf16.gmra.mxu2 %vm1088_vm13, %v1872_v4  ;;  %v1747_v40 = vrot.slane %v1745_v36, 1 }
 0x278   : > { %v1874_v54 = vsel %vm4135_vm10, %v1871_v43, %v1873_v42  ;;  %vm3847_vm10 = vmand %vm2042_vm2, %vm751_vm14  ;;  %vm2061_vm14 = vcmask 257024  }
 0x279   : > { %2882 = vmatmul.msk.bf16.gmra.mxu0 %vm1088_vm13, %v1740_v48  ;;  %v1748_v56 = vsel %vm4136_vm7, %v1743_v2, %v1747_v40  ;;  %v1751_v33 = vor.u32 %v1749_v22, %v1747_v40  ;;  %vm2074_vm7 = vcmask 257025   ;;  %vm3869_vm3 = vmand %vm2061_vm14, %vm4149_vm8 }
 0x284   : > { %2893 = vmatmul.msk.bf16.gmra.mxu1 %vm1088_vm13, %v1712_v31 }
 0x287   : > { %2903 = vmatmul.msk.bf16.gmra.mxu2 %vm1088_vm13, %v1874_v54 }
 0x289   : > { %2883 = vmatmul.msk.bf16.gmra.mxu0 %vm1088_vm13, %v1748_v56 }
 0x297   : > { %2904 = vmatmul.msk.bf16.gmra.mxu2 %vm1088_vm13, %v1873_v42 }
 0x299   : > { %2884 = vmatmul.msk.bf16.gmra.mxu0 %vm1088_vm13, %v1751_v33 }
 0x2c1   : > { %v1831_v30 = vpop.f32.mrf.mxu1 }
 0x2c9   : > { %v1833_v12 = vpop.f32.mrf.mxu1 }
 0x2d1   : > { %v1836_v3 = vpop.f32.mrf.mxu1 }
 0x2d2   : > { %v1782_v53 = vpop.f32.mrf.mxu0 }
 0x2d3   : > { %v1832_v57 = vadd.f32 %v1831_v30, %v1782_v53 }
 0x2d6   : > { %v1905_v13 = vpop.f32.mrf.mxu2 }
 0x2d7   : > { %v1929_v18 = vadd.f32 %v1905_v13, %v1832_v57 }
 0x2d9   : > { %v1838_v60 = vpop.f32.mrf.mxu1  ;;  %v1942_v35 = vadd.f32 %v3136_v20, %v1929_v18 }
 0x2da   : > { %v1784_v62 = vpop.f32.mrf.mxu0 }
 0x2db   : > { %v1834_v0 = vadd.f32 %v1833_v12, %v1784_v62  ;;  %v1951_v7 = vmax.f32 %v1942_v35, 0.0  ;;  %v2026_v35 = vld [vmem:[#allocation4] sm:$0x1] }
 0x2de   : > { %v1907_v63 = vpop.f32.mrf.mxu2 }
 0x2df   : > { %v1930_v6 = vadd.f32 %v1907_v63, %v1834_v0  ;;  %v3042_v63 = vld [vmem:[%s4010_s10] sm:$0xff] }
 0x2e1   : > { %v1943_v25 = vadd.f32 %v3136_v20, %v1930_v6  ;;  %v1841_v37 = vpop.f32.mrf.mxu1  ;;  %v2030_v6 = vld [vmem:[#allocation4 + $0x4] sm:$0x1] }
 0x2e3   : > { %v1952_v9 = vmax.f32 %v1943_v25, 0.0 }
 0x2e5   : > { %v3803_v8 = vpack.c.bf16 %v1952_v9, %v1951_v7  ;;  %v2031_v7 = vsel %vm2029_vm5, 0, %v2030_v6  ;;  %vm4152_vm5 = vmmov %vm4145_vm0  ;;  %vm2104_vm0 = vcmask 257026  }
 0x2e6   : > { %v1787_v14 = vpop.f32.mrf.mxu0  ;;  %2032 = vst [vmem:[#allocation4 + $0x4] sm:$0x1] %v2031_v7  ;;  %vm2090_vm6 = vmand %vm2074_vm7, %vm4152_vm5  ;;  %vm2371_vm5 = vsmask.f32 7946 }
 0x2e7   : > { %v1837_v10 = vadd.f32 %v1836_v3, %v1787_v14 }
 0x2e9   : > { %v1843_v58 = vpop.f32.mrf.mxu1 }
 0x2ea   : > { %v1910_v55 = vpop.f32.mrf.mxu2 }
 0x2eb   : > { %v1931_v17 = vadd.f32 %v1910_v55, %v1837_v10  ;;  %v2039_v10 = vld [vmem:[#allocation4 + $0xc] sm:$0x2]  ;;  %v2368_v55 = vld [vmem:[#allocation5] sm:$0x1] }
 0x2ed   : > { %v1944_v29 = vadd.f32 %v3136_v20, %v1931_v17  ;;  %v2376_v17 = vld [vmem:[#allocation5 + $0x4] sm:$0x2] }
 0x2ee   : > { %v1789_v59 = vpop.f32.mrf.mxu0 }
 0x2ef   : > { %v1839_v11 = vadd.f32 %v1838_v60, %v1789_v59  ;;  %v1953_v19 = vmax.f32 %v1944_v29, 0.0  ;;  %v2369_v59 = vsel %vm3816_vm15, 0, %v2368_v55  ;;  %v3045_v29 = vld [vmem:[%s4011_s11] sm:$0xff] }
 0x2f0   : > { %2370 = vst [vmem:[#allocation5] sm:$0x1] %v2369_v59 }
 0x2f1   : > { %v1846_v61 = vpop.f32.mrf.mxu1 }
 0x2f2   : > { %v1912_v39 = vpop.f32.mrf.mxu2 }
 0x2f3   : > { %v1932_v1 = vadd.f32 %v1912_v39, %v1839_v11  ;;  %v3046_v11 = vld [vmem:[%s4011_s11 + $0x8] sm:$0xff]  ;;  %v2044_v39 = vld [vmem:[#allocation4 + $0x10] sm:$0x4] }
 0x2f4   : > { %2227 = vmatpush.bf16.msra.mxu0 %v3046_v11 }
 0x2f5   : > { %v1945_v15 = vadd.f32 %v3136_v20, %v1932_v1  ;;  %v3050_v1 = vld [vmem:[%s4011_s11 + $0x28] sm:$0xff] }
 0x2f6   : > { %v1792_v16 = vpop.f32.mrf.mxu0  ;;  %2289 = vmatpush.bf16.msra.mxu1 %v3050_v1 }
 0x2f7   : > { %v1954_v28 = vmax.f32 %v1945_v15, 0.0  ;;  %v1842_v51 = vadd.f32 %v1841_v37, %v1792_v16  ;;  %v2027_v37 = vsel %vm3816_vm15, 0, %v2026_v35  ;;  %v2045_v16 = vsel %vm3847_vm10, 0, %v2044_v39  ;;  %v2385_v35 = vld [vmem:[#allocation5 + $0x8] sm:$0x4] }
 0x2f8   : > { %2028 = vst [vmem:[#allocation4] sm:$0x1] %v2027_v37  ;;  %2228 = vmatpush.bf16.msra.mxu0 %v3045_v29  ;;  %v2386_v25 = vsel %vm3847_vm10, 0, %v2385_v35  ;;  %vm4154_vm10 = vsmask.f32 7424 }
 0x2f9   : > { %v1848_v5 = vpop.f32.mrf.mxu1  ;;  %v1965_v38 = vpack.c.bf16 %v1954_v28, %v1953_v19  ;;  %2046 = vst [vmem:[#allocation4 + $0x10] sm:$0x4] %v2045_v16  ;;  %v3048_v19 = vld [vmem:[%s4011_s11 + $0x18] sm:$0xff]  ;;  %v3049_v28 = vld [vmem:[%s4011_s11 + $0x20] sm:$0xff]  ;;  %vm4156_vm8 = vmmov %vm4154_vm10 }
 0x2fa   : > { %v1915_v46 = vpop.f32.mrf.mxu2  ;;  %2290 = vmatpush.bf16.msra.mxu1 %v3049_v28  ;;  %2387 = vst [vmem:[#allocation5 + $0x8] sm:$0x4] %v2386_v25 }
 0x2fb   : > { %v1933_v56 = vadd.f32 %v1915_v46, %v1842_v51  ;;  %v3138_v46 = vld [vmem:[%s4009_s9] ss:$0 sm:$0xff] }
 0x2fd   : > { %v1946_v57 = vadd.f32 %v3136_v20, %v1933_v56 }
 0x2fe   : > { %v1794_v21 = vpop.f32.mrf.mxu0 }
 0x2ff   : > { %v1844_v31 = vadd.f32 %v1843_v58, %v1794_v21  ;;  %v1955_v62 = vmax.f32 %v1946_v57, 0.0  ;;  %v2040_v58 = vsel %vm2038_vm9, 0, %v2039_v10  ;;  %v2063_v51 = vld [vmem:[#allocation4] sm:$0xf]  ;;  %vm4153_vm9 = vcmask 1046528  }
 0x300   : > { %2041 = vst [vmem:[#allocation4 + $0xc] sm:$0x2] %v2040_v58  ;;  %vm4155_vm14 = vmmov %vm4153_vm9 }
 0x301   : > { %v1851_v23 = vpop.f32.mrf.mxu1 }
 0x302   : > { %v1917_v41 = vpop.f32.mrf.mxu2 }
 0x303   : > { %v1934_v40 = vadd.f32 %v1917_v41, %v1844_v31 }
 0x305   : > { %v1947_v12 = vadd.f32 %v3136_v20, %v1934_v40  ;;  %v2066_v40 = vld [vmem:[#allocation4 + $0x4] sm:$0x1] }
 0x306   : > { %v1797_v44 = vpop.f32.mrf.mxu0 }
 0x307   : > { %v1847_v48 = vadd.f32 %v1846_v61, %v1797_v44  ;;  %v1956_v18 = vmax.f32 %v1947_v12, 0.0  ;;  %v2377_v61 = vsel %vm3825_vm4, 0, %v2376_v17 }
 0x308   : > { %2378 = vst [vmem:[#allocation5 + $0x4] sm:$0x2] %v2377_v61 }
 0x309   : > { %v1853_v24 = vpop.f32.mrf.mxu1  ;;  %v1966_v0 = vpack.c.bf16 %v1956_v18, %v1955_v62 }
 0x30a   : > { %v1920_v43 = vpop.f32.mrf.mxu2 }
 0x30b   : > { %v1935_v32 = vadd.f32 %v1920_v43, %v1847_v48 }
 0x30d   : > { %v1948_v22 = vadd.f32 %v3136_v20, %v1935_v32 }
 0x30e   : > { %v1799_v34 = vpop.f32.mrf.mxu0 }
 0x30f   : > { %v1849_v4 = vadd.f32 %v1848_v5, %v1799_v34  ;;  %v1957_v13 = vmax.f32 %v1948_v22, 0.0  ;;  %v3137_v5 = vld [vmem:[%s4148_s8] ss:$0 sm:$0xff] }
 0x312   : > { %v1922_v49 = vpop.f32.mrf.mxu2 }
 0x313   : > { %v1936_v45 = vadd.f32 %v1922_v49, %v1849_v4 }
 0x315   : > { %v1949_v54 = vadd.f32 %v3136_v20, %v1936_v45 }
 0x316   : > { %v1802_v50 = vpop.f32.mrf.mxu0 }
 0x317   : > { %v1852_v52 = vadd.f32 %v1851_v23, %v1802_v50  ;;  %v1958_v3 = vmax.f32 %v1949_v54, 0.0 }
 0x319   : > { %v1967_v60 = vpack.c.bf16 %v1958_v3, %v1957_v13  ;;  %v2096_v3 = vld [vmem:[#allocation4 + $0xc] sm:$0x3] }
 0x31a   : > { %v1925_v47 = vpop.f32.mrf.mxu2 }
 0x31b   : > { %v1937_v27 = vadd.f32 %v1925_v47, %v1852_v52 }
 0x31d   : > { %v1950_v36 = vadd.f32 %v3136_v20, %v1937_v27  ;;  %v3043_v20 = vld [vmem:[%s4010_s10 + $0x8] sm:$0xff] }
 0x31e   : > { %v1804_v42 = vpop.f32.mrf.mxu0 }
 0x31f   : > { %v1959_v2 = vmax.f32 %v1950_v36, 0.0 }
 0x321   : > { %v1968_v33 = vpack.c.bf16 %v1959_v2, %v1959_v2 }
 0x322   : > { %v1927_v30 = vpop.f32.mrf.mxu2 }
 0x323   : > { %v1987_v53 = vand.u32 %v1968_v33, %v3657_v26 }
 0x325   : > { %1992 = vmatpush.bf16.msra.mxu2 %v1987_v53  ;;  %3088 = vmatpush.bf16.msra.mxu3 %v1987_v53 }
 0x329   : > { %1993 = vmatpush.bf16.msra.mxu2 %v1967_v60  ;;  %3089 = vmatpush.bf16.msra.mxu3 %v1967_v60 }
 0x32d   : > { %1994 = vmatpush.bf16.msra.mxu2 %v1966_v0  ;;  %3090 = vmatpush.bf16.msra.mxu3 %v1966_v0 }
 0x331   : > { %1995 = vmatpush.bf16.msra.mxu2 %v1965_v38  ;;  %3091 = vmatpush.bf16.msra.mxu3 %v1965_v38  ;;  %v3047_v38 = vld [vmem:[%s4011_s11 + $0x10] sm:$0xff] }
 0x335   : > { %1996 = vmatpush.bf16.msra.mxu2 %v3803_v8  ;;  %3092 = vmatpush.bf16.msra.mxu3 %v3803_v8  ;;  %v2035_v8 = vld [vmem:[#allocation4 + $0x8] sm:$0x2] }
 0x336   : > { %v2036_v14 = vsel %vm3825_vm4, 0, %v2035_v8 }
 0x337   : > { %2037 = vst [vmem:[#allocation4 + $0x8] sm:$0x2] %v2036_v14 }
 0x338   : > { %2913 = vmatmul.msk.bf16.vlgmr.msra.gmra.mxu2 %vm1979_vm11, %v3042_v63  ;;  %2914 = vmatmul.msk.bf16.vlgmr.msra.gmra.mxu3 %vm1979_vm11, %v3043_v20  ;;  %vm2094_vm11 = vcmask 254976  }
 0x339   : > { %2186 = vmatpush.bf16.msrb.mxu3 %v3048_v19  ;;  %vm2095_vm4 = vmand %vm2094_vm11, %vm4142_vm1  ;;  %vm2379_vm1 = vcmask 257027  }
 0x33d   : > { %2187 = vmatpush.bf16.msrb.mxu3 %v3047_v38 }
 0x33e   : > { %v2091_v30 = vld [vmem:[#allocation4 + $0x8] sm:$0xe] }
 0x3bb   : > { %v1998_v21 = vpop.f32.mrf.mxu2  ;;  %v2003_v23 = vpop.f32.mrf.mxu3 }
 0x3bc   : > { %v2012_v41 = vmul.f32 %v3137_v5, %v1998_v21  ;;  %v2014_v44 = vmul.f32 %v3137_v5, %v2003_v23 }
 0x3be   : > { %v2020_v24 = vadd.f32 %v3138_v46, %v2012_v41  ;;  %v2022_v43 = vadd.f32 %v3138_v46, %v2014_v44 }
 0x3c0   : > { %v2047_v34 = vpack.c.bf16 %v2020_v24, %v2020_v24  ;;  %v2049_v49 = vpack.c.bf16 %v2022_v43, %v2022_v43 }
 0x3c2   : > { %v2052_v50 = vshrl.u32 %v2047_v34, 16  ;;  %v2079_v4 = vshrl.u32 %v2049_v49, 16  ;;  %v2082_v52 = vshll.u32 %v2049_v49, 16  ;;  %v2055_v47 = vshll.u32 %v2047_v34, 16 }
 0x3c3   : > { %v2000_v48 = vpop.f32.mrf.mxu2  ;;  %v2005_v45 = vpop.f32.mrf.mxu3 }
 0x3c4   : > { %v2054_v27 = vrot.slane %v2052_v50, 7  ;;  %v2081_v31 = vrot.slane %v2079_v4, 6  ;;  %v2084_v32 = vrot.slane %v2082_v52, 7  ;;  %v2013_v36 = vmul.f32 %v3137_v5, %v2000_v48 }
 0x3c5   : > { %v2015_v54 = vmul.f32 %v3137_v5, %v2005_v45 }
 0x3c6   : > { %v2057_v2 = vor.u32 %v2055_v47, %v2054_v27  ;;  %v2058_v56 = vrot.slane %v2054_v27, 4  ;;  %v2085_v22 = vor.u32 %v2084_v32, %v2081_v31  ;;  %v2021_v33 = vadd.f32 %v3138_v46, %v2013_v36 }
 0x3c7   : > { %v2023_v12 = vadd.f32 %v3138_v46, %v2015_v54 }
 0x3c8   : > { %v2064_v53 = vsel %vm3869_vm3, %v2057_v2, %v2063_v51  ;;  %v2067_v57 = vsel %vm3816_vm15, %v2058_v56, %v2066_v40  ;;  %v2086_v13 = vrot.slane %v2085_v22, 4  ;;  %v2048_v18 = vpack.c.bf16 %v2021_v33, %v2021_v33 }
 0x3c9   : > { %2065 = vst [vmem:[#allocation4] sm:$0xf] %v2064_v53  ;;  %v2092_v60 = vsel %vm2090_vm6, %v2085_v22, %v2091_v30  ;;  %v2050_v62 = vpack.c.bf16 %v2023_v12, %v2023_v12  ;;  %vm2170_vm15 = vcmask 261120   ;;  %v3139_v53 = vld [vmem:[%s4012_s12] ss:$0 sm:$0xff]  ;;  %vm2335_vm3 = vcmask 285696   ;;  %vm2372_vm6 = vmand %vm2042_vm2, %vm2371_vm5 }
 0x3ca   : > { %2068 = vst [vmem:[#allocation4 + $0x4] sm:$0x1] %v2067_v57  ;;  %v2070_v0 = vrot.slane %v2048_v18, 7  ;;  %v2097_v63 = vsel %vm2095_vm4, %v2086_v13, %v2096_v3  ;;  %vm2380_vm4 = vsmask.f32 7950  ;;  %vm2398_vm2 = vcmask 256000  }
 0x3cb   : > { %2093 = vst [vmem:[#allocation4 + $0x8] sm:$0xe] %v2092_v60  ;;  %v2100_v20 = vrot.slane %v2050_v62, 6 }
 0x3cc   : > { %v2071_v6 = vrot.slane %v2070_v0, 4  ;;  %2075 = vst.msk [vmem:[#allocation4 + $0x4] sm:$0xe] %vm2074_vm7, %v2070_v0 }
 0x3cd   : > { %2098 = vst [vmem:[#allocation4 + $0xc] sm:$0x3] %v2097_v63  ;;  %v2101_v37 = vrot.slane %v2100_v20, 4 }
 0x3ce   : > { %2077 = vst.msk [vmem:[#allocation4 + $0x8] sm:$0x1] %vm2024_vm12, %v2071_v6 }
 0x3cf   : > { %2105 = vst.msk [vmem:[#allocation4 + $0xc] sm:$0xc] %vm2104_vm0, %v2100_v20  ;;  %vm2381_vm0 = vmand %vm2379_vm1, %vm2380_vm4 }
 0x3d0   : > { %2107 = vst.msk [vmem:[#allocation4 + $0x10] sm:$0x3] %vm2094_vm11, %v2101_v37  ;;  %v3083_v8 = vld [vmem:[#allocation4] sm:$0xe] }
 0x3d3   : > { %v3069_v7 = vld [vmem:[#allocation4] sm:$0xff]  }
 0x3d4   : > { %v3082_v9 = vld [vmem:[#allocation4] sm:$0xf0]  ;;  %v2138_v14 = vshll.u32 %v3069_v7, 16  ;;  %2942 = vmatmul.msk.bf16.vlgmr.msra.gmra.mxu0 %vm2170_vm15, %v3069_v7  ;;  %v2136_v58 = vshrl.u32 %v3069_v7, 16 }
 0x3d5   : > { %v3084_v10 = vor.u32 %v3083_v8, %v3082_v9 }
 0x3d6   : > { %v2140_v55 = vrot.slane %v2138_v14, 1  ;;  %v3044_v59 = vld [vmem:[#allocation4 + $0x8] sm:$0xff] }
 0x3d7   : > { %v2257_v17 = vrot.slane %v3084_v10, 1  ;;  %v2258_v11 = vrot.slane %v3044_v59, 1  ;;  %v2143_v39 = vshll.u32 %v3044_v59, 16  ;;  %v2112_v29 = vld [vmem:[#allocation4 + $0x10] sm:$0x3]  ;;  %v2147_v41 = vshrl.u32 %v3044_v59, 16 }
 0x3d8   : > { %v2141_v61 = vor.u32 %v2140_v55, %v2136_v58  ;;  %v2245_v16 = vld [vmem:[#allocation4 + $0x10] sm:$0x7]  ;;  %v2131_v28 = vunpack.c.l.b16 %v2112_v29  ;;  %v2382_v29 = vld [vmem:[#allocation5 + $0x4] sm:$0x8] }
 0x3d9   : > { %v2259_v1 = vsel %vm4153_vm9, %v2257_v17, %v2258_v11  ;;  %v2145_v15 = vrot.slane %v2143_v39, 1  ;;  %v2254_v5 = vunpack.c.l.b16 %v2245_v16  ;;  %v2373_v39 = vld [vmem:[#allocation5] sm:$0x4]  ;;  %v3053_v16 = vld [vmem:[%s4016_s16 + $0x8] sm:$0xff]  ;;  %vm2399_vm9 = vsmask.f32 2306 }
 0x3da   : > { %2957 = vmatmul.msk.bf16.vlgmr.msra.gmra.mxu1 %vm2170_vm15, %v2259_v1  ;;  %v2134_v38 = vpack.c.b16 %v2131_v28, %v2131_v28  ;;  %v2374_v1 = vsel %vm2372_vm6, 0, %v2373_v39  ;;  %v3052_v28 = vld [vmem:[%s4016_s16] sm:$0xff] }
 0x3db   : > { %v2146_v19 = vsel %vm4154_vm10, %v2141_v61, %v2145_v15  ;;  %v2256_v46 = vpack.c.b16 %v2254_v5, %v2254_v5  ;;  %v2149_v44 = vor.u32 %v2147_v41, %v2145_v15  ;;  %v3051_v61 = vld [vmem:[%s4015_s15] sm:$0xff]  ;;  %2375 = vst [vmem:[#allocation5] sm:$0x4] %v2374_v1  ;;  %v2383_v15 = vsel %vm2381_vm0, 0, %v2382_v29  ;;  %vm2400_vm10 = vmand %vm2398_vm2, %vm2399_vm9 }
 0x3dc   : > { %2931 = vmatmul.msk.bf16.vlgmr.msrb.gmra.mxu3 %vm2170_vm15, %v2146_v19  ;;  %v2151_v21 = vshll.u32 %v2134_v38, 16  ;;  %v2155_v49 = vshrl.u32 %v2134_v38, 16  ;;  %2384 = vst [vmem:[#allocation5 + $0x4] sm:$0x8] %v2383_v15  ;;  %v3055_v19 = vld [vmem:[%s4016_s16 + $0x18] sm:$0xff] }
 0x3dd   : > { %v2260_v23 = vrot.slane %v2256_v46, 1  ;;  %2490 = vmatpush.bf16.msra.mxu3 %v3055_v19  ;;  %v3140_v5 = vld [vmem:[%s4013_s13] ss:$0 sm:$0xff] }
 0x3de   : > { %v2153_v24 = vrot.slane %v2151_v21, 1  ;;  %v3058_v19 = vld [vmem:[%s4021_s21] sm:$0xff] }
 0x3df   : > { %v2261_v43 = vsel %vm4155_vm14, %v2258_v11, %v2260_v23  ;;  %vm2421_vm14 = vsmask.f32 3334 }
 0x3e0   : > { %v2154_v34 = vsel %vm4156_vm8, %v2149_v44, %v2153_v24  ;;  %v2157_v50 = vor.u32 %v2155_v49, %v2153_v24  ;;  %vm2422_vm8 = vmand %vm2074_vm7, %vm2421_vm14  ;;  %vm4158_vm7 = vcmask 1046528  }
 0x3e4   : > { %2943 = vmatmul.msk.bf16.gmra.mxu0 %vm2170_vm15, %v3044_v59 }
 0x3ea   : > { %2958 = vmatmul.msk.bf16.gmra.mxu1 %vm2170_vm15, %v2261_v43 }
 0x3ec   : > { %2932 = vmatmul.msk.bf16.gmra.mxu3 %vm2170_vm15, %v2154_v34 }
 0x3f4   : > { %2944 = vmatmul.msk.bf16.gmra.mxu0 %vm2170_vm15, %v2134_v38  ;;  %v3141_v38 = vld [vmem:[%s4014_s14] ss:$0 sm:$0xff] }
 0x3fa   : > { %2959 = vmatmul.msk.bf16.gmra.mxu1 %vm2170_vm15, %v2260_v23  ;;  %v3054_v23 = vld [vmem:[%s4016_s16 + $0x10] sm:$0xff] }
 0x3fb   : > { %2491 = vmatpush.bf16.msra.mxu3 %v3054_v23  ;;  %v3142_v23 = vld [vmem:[%s4017_s17] ss:$0 sm:$0xff] }
 0x3fc   : > { %2933 = vmatmul.msk.bf16.gmra.mxu3 %vm2170_vm15, %v2157_v50 }
 0x451   : > { %v2230_v4 = vpop.f32.mrf.mxu0 }
 0x457   : > { %v2292_v52 = vpop.f32.mrf.mxu1 }
 0x459   : > { %v2232_v47 = vpop.f32.mrf.mxu0 }
 0x45f   : > { %v2189_v48 = vpop.f32.mrf.mxu3  ;;  %v2294_v45 = vpop.f32.mrf.mxu1 }
 0x460   : > { %v2231_v60 = vadd.f32 %v2230_v4, %v2189_v48 }
 0x461   : > { %v2235_v27 = vpop.f32.mrf.mxu0 }
 0x462   : > { %v2306_v37 = vadd.f32 %v2292_v52, %v2231_v60 }
 0x464   : > { %v2315_v10 = vadd.f32 %v3139_v53, %v2306_v37 }
 0x466   : > { %v2320_v17 = vmax.f32 %v2315_v10, 0.0 }
 0x467   : > { %v2191_v31 = vpop.f32.mrf.mxu3  ;;  %v2297_v32 = vpop.f32.mrf.mxu1 }
 0x468   : > { %v2233_v57 = vadd.f32 %v2232_v47, %v2191_v31  ;;  %v2401_v47 = vld [vmem:[#allocation5] sm:$0x7] }
 0x469   : > { %v2237_v36 = vpop.f32.mrf.mxu0 }
 0x46a   : > { %v2307_v63 = vadd.f32 %v2294_v45, %v2233_v57 }
 0x46c   : > { %v2316_v9 = vadd.f32 %v3139_v53, %v2307_v63 }
 0x46e   : > { %v2321_v55 = vmax.f32 %v2316_v9, 0.0 }
 0x46f   : > { %v2194_v42 = vpop.f32.mrf.mxu3  ;;  %v2299_v51 = vpop.f32.mrf.mxu1 }
 0x470   : > { %v2236_v12 = vadd.f32 %v2235_v27, %v2194_v42  ;;  %v2327_v11 = vpack.c.bf16 %v2321_v55, %v2320_v17 }
 0x471   : > { %v2240_v40 = vpop.f32.mrf.mxu0 }
 0x472   : > { %v2308_v62 = vadd.f32 %v2297_v32, %v2236_v12 }
 0x474   : > { %v2317_v25 = vadd.f32 %v3139_v53, %v2308_v62 }
 0x476   : > { %v2322_v58 = vmax.f32 %v2317_v25, 0.0 }
 0x477   : > { %v2196_v54 = vpop.f32.mrf.mxu3  ;;  %v2302_v2 = vpop.f32.mrf.mxu1 }
 0x478   : > { %v2238_v22 = vadd.f32 %v2237_v36, %v2196_v54  ;;  %v2423_v54 = vld [vmem:[#allocation5 + $0x4] sm:$0xe] }
 0x479   : > { %v2242_v56 = vpop.f32.mrf.mxu0 }
 0x47a   : > { %v2309_v13 = vadd.f32 %v2299_v51, %v2238_v22  ;;  %v3057_v22 = vld [vmem:[%s4016_s16 + $0x28] sm:$0xff] }
 0x47b   : > { %2576 = vmatpush.bf16.msrb.mxu3 %v3057_v22 }
 0x47c   : > { %v2318_v20 = vadd.f32 %v3139_v53, %v2309_v13 }
 0x47e   : > { %v2323_v8 = vmax.f32 %v2318_v20, 0.0 }
 0x47f   : > { %v2199_v33 = vpop.f32.mrf.mxu3  ;;  %v2304_v30 = vpop.f32.mrf.mxu1 }
 0x480   : > { %v2241_v3 = vadd.f32 %v2240_v40, %v2199_v33  ;;  %v2328_v59 = vpack.c.bf16 %v2323_v8, %v2322_v58  ;;  %v3056_v33 = vld [vmem:[%s4016_s16 + $0x20] sm:$0xff] }
 0x481   : > { %2577 = vmatpush.bf16.msrb.mxu3 %v3056_v33 }
 0x482   : > { %v2310_v18 = vadd.f32 %v2302_v2, %v2241_v3 }
 0x484   : > { %v2319_v0 = vadd.f32 %v3139_v53, %v2310_v18 }
 0x486   : > { %v2324_v35 = vmax.f32 %v2319_v0, 0.0 }
 0x487   : > { %v2201_v6 = vpop.f32.mrf.mxu3 }
 0x488   : > { %v2329_v7 = vpack.c.bf16 %v2324_v35, %v2324_v35 }
 0x48a   : > { %v2340_v14 = vand.u32 %v2329_v7, %v3657_v26 }
 0x48c   : > { %2347 = vmatpush.bf16.msrb.mxu2 %v2340_v14 }
 0x490   : > { %2348 = vmatpush.bf16.msrb.mxu2 %v2328_v59 }
 0x494   : > { %2349 = vmatpush.bf16.msrb.mxu2 %v2327_v11 }
 0x497   : > { %2964 = vmatmul.msk.bf16.vlgmr.msrb.gmra.mxu2 %vm2335_vm3, %v3051_v61 }
 0x498   : > { %2524 = vmatpush.bf16.msra.mxu2 %v3053_v16  ;;  %v3059_v16 = vld [vmem:[%s4021_s21 + $0x8] sm:$0xff] }
 0x499   : > { %2664 = vmatpush.bf16.msrb.mxu1 %v3059_v16 }
 0x49c   : > { %2525 = vmatpush.bf16.msra.mxu2 %v3052_v28 }
 0x49d   : > { %2665 = vmatpush.bf16.msrb.mxu1 %v3058_v19 }
 0x51a   : > { %v2351_v46 = vpop.f32.mrf.mxu2 }
 0x51b   : > { %v2360_v21 = vmul.f32 %v3140_v5, %v2351_v46 }
 0x51d   : > { %v2366_v41 = vadd.f32 %v3141_v38, %v2360_v21 }
 0x51f   : > { %v2388_v44 = vpack.c.bf16 %v2366_v41, %v2366_v41 }
 0x521   : > { %v2391_v24 = vshrl.u32 %v2388_v44, 16  ;;  %v2405_v43 = vrot.slane %v2388_v44, 7  ;;  %v2394_v50 = vshll.u32 %v2388_v44, 16 }
 0x522   : > { %v2353_v34 = vpop.f32.mrf.mxu2 }
 0x523   : > { %v2393_v49 = vrot.slane %v2391_v24, 7  ;;  %v2406_v4 = vrot.slane %v2405_v43, 4  ;;  %2410 = vst.msk [vmem:[#allocation5] sm:$0x8] %vm2379_vm1, %v2405_v43  ;;  %v2361_v52 = vmul.f32 %v3140_v5, %v2353_v34 }
 0x525   : > { %v2396_v48 = vor.u32 %v2394_v50, %v2393_v49  ;;  %2411 = vst.msk [vmem:[#allocation5 + $0x4] sm:$0x1] %vm2024_vm12, %v2406_v4  ;;  %v2367_v45 = vadd.f32 %v3141_v38, %v2361_v52  ;;  %vm4157_vm12 = vsmask.f32 7424 }
 0x527   : > { %v2402_v27 = vsel %vm2400_vm10, %v2396_v48, %v2401_v47  ;;  %v2389_v31 = vpack.c.bf16 %v2367_v45, %v2367_v45 }
 0x528   : > { %2403 = vst [vmem:[#allocation5] sm:$0x7] %v2402_v27 }
 0x529   : > { %v2413_v32 = vshrl.u32 %v2389_v31, 16  ;;  %v2416_v36 = vshll.u32 %v2389_v31, 16  ;;  %v2965_v42 = vrot.slane %v2389_v31, 10  ;;  %v2601_v31 = vld [vmem:[%s4020_s20] sm:$0xf] }
 0x52b   : > { %v2415_v51 = vrot.slane %v2413_v32, 6  ;;  %v2418_v40 = vrot.slane %v2416_v36, 7  ;;  %2430 = vst.msk [vmem:[#allocation5 + $0x8] sm:$0x3] %vm2094_vm11, %v2965_v42  ;;  %vm2604_vm11 = vcmask 154624  }
 0x52c   : > { %v3143_v32 = vld [vmem:[%s4018_s18] ss:$0 sm:$0xff] }
 0x52d   : > { %v2419_v2 = vor.u32 %v2418_v40, %v2415_v51 }
 0x52f   : > { %v2424_v56 = vsel %vm2422_vm8, %v2419_v2, %v2423_v54  ;;  %v3086_v7 = vld [vmem:[#allocation5] sm:$0xe]  ;;  %v3145_v2 = vld [vmem:[%s4022_s22] ss:$0 sm:$0xff] }
 0x530   : > { %2425 = vst [vmem:[#allocation5 + $0x4] sm:$0xe] %v2424_v56 }
 0x532   : > { %v2433_v30 = vld [vmem:[#allocation5 + $0x8] sm:$0x3] }
 0x533   : > { %v2448_v12 = vunpack.c.l.b16 %v2433_v30  ;;  %v2537_v6 = vld [vmem:[#allocation5 + $0x8] sm:$0x7] }
 0x534   : > { %v2546_v25 = vunpack.c.l.b16 %v2537_v6 }
 0x535   : > { %v2450_v3 = vpack.c.b16 %v2448_v12, %v2448_v12 }
 0x536   : > { %v2548_v8 = vpack.c.b16 %v2546_v25, %v2546_v25 }
 0x537   : > { %v3073_v53 = vld [vmem:[#allocation5] sm:$0xff]   ;;  %v2459_v13 = vshll.u32 %v2450_v3, 16  ;;  %v2463_v20 = vshrl.u32 %v2450_v3, 16 }
 0x538   : > { %v2454_v57 = vshll.u32 %v3073_v53, 16  ;;  %2988 = vmatmul.msk.bf16.vlgmr.msra.gmra.mxu2 %vm2170_vm15, %v3073_v53  ;;  %v2452_v18 = vshrl.u32 %v3073_v53, 16  ;;  %v3085_v37 = vld [vmem:[#allocation5] sm:$0xf0]  ;;  %v2550_v10 = vrot.slane %v2548_v8, 1 }
 0x539   : > { %v2461_v0 = vrot.slane %v2459_v13, 1  ;;  %v3087_v9 = vor.u32 %v3086_v7, %v3085_v37 }
 0x53a   : > { %v2456_v60 = vrot.slane %v2454_v57, 1 }
 0x53b   : > { %v2465_v35 = vor.u32 %v2463_v20, %v2461_v0  ;;  %v2549_v14 = vrot.slane %v3087_v9, 1 }
 0x53c   : > { %v2457_v62 = vor.u32 %v2456_v60, %v2452_v18 }
 0x53d   : > { %v2551_v58 = vsel %vm4158_vm7, %v2549_v14, %v2550_v10 }
 0x53e   : > { %v2462_v63 = vsel %vm4157_vm12, %v2457_v62, %v2461_v0 }
 0x53f   : > { %2978 = vmatmul.msk.bf16.vlgmr.msra.gmra.mxu3 %vm2170_vm15, %v2462_v63 }
 0x548   : > { %2989 = vmatmul.msk.bf16.gmra.mxu2 %vm2170_vm15, %v2450_v3 }
 0x54f   : > { %2979 = vmatmul.msk.bf16.gmra.mxu3 %vm2170_vm15, %v2465_v35 }
 0x55f   : > { %3002 = vmatmul.msk.bf16.vlgmr.msrb.gmra.mxu3 %vm2170_vm15, %v2551_v58 }
 0x56f   : > { %3003 = vmatmul.msk.bf16.gmra.mxu3 %vm2170_vm15, %v2550_v10 }
 0x5bb   : > { %v2527_v55 = vpop.f32.mrf.mxu2 }
 0x5c2   : > { %v2493_v59 = vpop.f32.mrf.mxu3 }
 0x5c3   : > { %v2529_v17 = vpop.f32.mrf.mxu2  ;;  %v2528_v21 = vadd.f32 %v2527_v55, %v2493_v59 }
 0x5ca   : > { %v2495_v11 = vpop.f32.mrf.mxu3 }
 0x5cb   : > { %v2532_v61 = vpop.f32.mrf.mxu2  ;;  %v2530_v5 = vadd.f32 %v2529_v17, %v2495_v11 }
 0x5d2   : > { %v2498_v39 = vpop.f32.mrf.mxu3 }
 0x5d3   : > { %v2534_v29 = vpop.f32.mrf.mxu2  ;;  %v2533_v38 = vadd.f32 %v2532_v61, %v2498_v39 }
 0x5da   : > { %v2500_v1 = vpop.f32.mrf.mxu3 }
 0x5e2   : > { %v2579_v15 = vpop.f32.mrf.mxu3 }
 0x5e3   : > { %v2588_v24 = vadd.f32 %v2579_v15, %v2528_v21 }
 0x5e5   : > { %v2595_v50 = vadd.f32 %v3142_v23, %v2588_v24 }
 0x5e7   : > { %v2598_v45 = vmax.f32 %v2595_v50, 0.0 }
 0x5ea   : > { %v2581_v28 = vpop.f32.mrf.mxu3 }
 0x5eb   : > { %v2589_v41 = vadd.f32 %v2581_v28, %v2530_v5 }
 0x5ed   : > { %v2596_v34 = vadd.f32 %v3142_v23, %v2589_v41 }
 0x5ef   : > { %v2599_v47 = vmax.f32 %v2596_v34, 0.0 }
 0x5f1   : > { %v2602_v27 = vpack.c.bf16 %v2599_v47, %v2598_v45 }
 0x5f2   : > { %v2584_v46 = vpop.f32.mrf.mxu3 }
 0x5f3   : > { %v2590_v44 = vadd.f32 %v2584_v46, %v2533_v38 }
 0x5f5   : > { %v2597_v43 = vadd.f32 %v3142_v23, %v2590_v44 }
 0x5f7   : > { %v2600_v49 = vmax.f32 %v2597_v43, 0.0 }
 0x5f9   : > { %v2603_v4 = vpack.c.bf16 %v2600_v49, %v2600_v49 }
 0x5fa   : > { %v2586_v52 = vpop.f32.mrf.mxu3 }
 0x5fb   : > { %v2609_v48 = vand.u32 %v2603_v4, %v3657_v26  ;;  %v3144_v26 = vld [vmem:[%s4019_s19] ss:$0 sm:$0xff] }
 0x5fd   : > { %2617 = vmatpush.bf16.msrb.mxu0 %v2609_v48 }
 0x601   : > { %2618 = vmatpush.bf16.msrb.mxu0 %v2602_v27 }
 0x604   : > { %3004 = vmatmul.msk.bf16.vlgmr.msrb.gmra.mxu0 %vm2604_vm11, %v2601_v31 }
 0x681   : > { %v2620_v36 = vpop.f32.mrf.mxu0 }
 0x682   : > { %v2628_v42 = vmul.f32 %v3143_v32, %v2620_v36 }
 0x684   : > { %v2633_v51 = vadd.f32 %v3144_v26, %v2628_v42 }
 0x686   : > { %v2634_v40 = vpack.c.bf16 %v2633_v51, %v2633_v51 }
 0x688   : > { %3013 = vmatmul.msk.bf16.vlgmr.msrb.gmra.mxu1 %vm2170_vm15, %v2634_v40 }
 0x689   : > { %v2622_v54 = vpop.f32.mrf.mxu0 }
 0x705   : > { %v2667_v56 = vpop.f32.mrf.mxu1 }
 0x706   : > { %v2668_v22 = vadd.f32 %v3145_v2, %v2667_v56 }
 0x708   : > { %3146 = vtanh.f32 %v2668_v22 }
 0x70d   : > { %v2669_v33 = vpop.f32.mrf.mxu1 }
 0x70e   : > { %v3147_v30 = vpop.eup %3146 }
 0x70f   : > { %2672 = vst.msk [vmem:[%s704_s24] sm:$0xff] %vm1088_vm13, %v3147_v30 }
 0x710   : > { %3175 = shalt.err (!%p3172_p3)
}
 0x711   : > { %3093 = dma.vmem_to_hbm [thread:$0]  (%p3371_p5), %s2687_s25, 128, %s2689_s1, %s2674_s27  }
 0x712 PF: > { %s4159_s26 = sld [smem:[#allocation11_spill]] }
 0x713   : > { %s4160_s24 = sld [smem:[#allocation9_spill]] }
 0x718   : > { %p3099_p4 = scmp.ge.s32.totalorder %s4159_s26, 2 }
 0x719   : > { %s2700_s8 = sand.u32 1, %s4160_s24  }
 0x71a   : > { %p3096_p7 = pnand %p3099_p4, %p3375_p6  ;;  %s2701_s29 = scalar_lea.sflag [#allocation7], %s2700_s8 }
 0x71c   : > { %p3097_p8 = pneg %p3096_p7 }
 0x71e   : > { %3193 = dma.done.wait (%p3097_p8), %s2701_s29, 128  }
 0x71f   : > { %3195 = vsyncadd (%p3097_p8), %s2701_s29, 4294967168  ;;  %s4162_s25 = sld [smem:[#allocation12_spill]]  ;;  %s4165_s4 = smov %s3202_s30 }
 0x720   : > { %s4163_s28 = sld [smem:[#allocation10_spill]] }
 0x721   : > { %s4164_s24 = sld [smem:[#allocation13_spill]] }
 0x725   : > { %p33_p9 = scmp.ge.s32.totalorder %s4162_s25, 4  }
 0x726   : > { %s4166_s30 = smov %s4163_s28 }
 0x727   :  { %35 = sbr.rel (!%p33_p9) target bundleno = 13 (0xd), region = 155 }
 0x72c   :  { %2707 = vsyncpa [#allocation7], 1 }
 0x72d   :  { %2709 = vsyncpa [#allocation7 + $0x1], 1 }

</bundles_post_ra>
